<compile_context>
chip_gen: v6e
topology: v6e:2x2x1
jax: 0.10.0
libtpu: 0.0.40
codegen_flags: <defaults>
</compile_context>

<pallas_src>
import functools

import jax
import jax.numpy as jnp
import numpy as np
from jax.experimental import pallas as pl
from jax.experimental.pallas import tpu as pltpu


def _tprompt_kernel(md,
                    tok_ref, ent_ref,
                    tp1_w1, tp1_b1, tp1_w2, tp1_b2,
                    tp2_w, tp2_b, ca_w,
                    pp1_w1, pp1_b1, pp1_w2, pp1_b2,
                    pp2_w, pp2_b,
                    out_ref, full2_ref):
    """Grid = (batch_blocks, LB // lb_group).

    The heavy batch-dependent front path (token_proj1/2, cross-attn softmax,
    prompt_proj1) runs once per batch block (at g == 0) and is carried across the
    column-tile axis in the `full2_ref` VMEM scratch (stored in matmul dtype).
    Each grid step then does one lane-dense (Bb*T, H) x (H, lb_group*H) tile of
    prompt_proj2.

    NOTE: the g==0 scratch-carry relies on the second grid axis being the innermost,
    sequential ("arbitrary") axis; do not reorder the grid or mark it "parallel".
    """
    f32 = jnp.float32
    g = pl.program_id(1)
    Bb, T, Th = tok_ref.shape
    _, E, H = ent_ref.shape
    GH = out_ref.shape[-1]                    # lb_group * H

    @pl.when(g == 0)
    def _():
        tok_md = tok_ref[...].reshape(Bb * T, Th)     # already matmul dtype (wrapper cast)
        tok32 = tok_md.astype(f32)                    # f32 copy for the residual add
        ent = ent_ref[...]                            # (Bb, E, H), matmul dtype

        # token_proj1 (Linear -> ReLU -> Linear) + residual
        h = jnp.maximum(
            jnp.dot(tok_md, tp1_w1[...], preferred_element_type=f32) + tp1_b1[...],
            0.0)
        tok1 = (jnp.dot(h.astype(md), tp1_w2[...], preferred_element_type=f32)
                + tp1_b2[...] + tok32)

        # token_proj2 -> hidden
        tok_h = (jnp.dot(tok1.astype(md), tp2_w[...], preferred_element_type=f32)
                 + tp2_b[...])                        # (Bb*T, H) f32

        # cross attention; the 1/hidden_size scale is folded into ca_w in the wrapper.
        # TODO(synk): for multi-thousand E, chunk this over E with an online softmax
        # instead of materializing the full (Bb, T, E) f32 logits (v7x VMEM).
        q = jnp.dot(tok_h.astype(md), ca_w[...],
                    preferred_element_type=f32).reshape(Bb, T, H)
        logits = jax.lax.dot_general(                 # (Bb, T, E); no materialized ent.T
            q.astype(md), ent,
            dimension_numbers=(((2,), (2,)), ((0,), (0,))),
            preferred_element_type=f32)
        m = jnp.max(logits, axis=-1, keepdims=True)
        p = jnp.exp(logits - m)
        wts = p * pl.reciprocal(jnp.sum(p, axis=-1, keepdims=True), approx=True)
        ctx = jax.lax.dot_general(                    # (Bb, T, H)
            wts.astype(md), ent,
            dimension_numbers=(((2,), (1,)), ((0,), (0,))),
            preferred_element_type=f32)
        prompt = ctx.reshape(Bb * T, H) + tok_h

        # prompt_proj1 + residual (prompt rows only; prefix rows handled in wrapper)
        gg = jnp.maximum(
            jnp.dot(prompt.astype(md), pp1_w1[...], preferred_element_type=f32)
            + pp1_b1[...], 0.0)
        full2 = (jnp.dot(gg.astype(md), pp1_w2[...], preferred_element_type=f32)
                 + pp1_b2[...] + prompt)
        full2_ref[...] = full2.astype(full2_ref.dtype)   # carried in matmul dtype

    # ---- prompt_proj2: one lb_group-wide column tile per grid step ----
    out_g = (jnp.dot(full2_ref[...], pp2_w[0], preferred_element_type=f32)
             + pp2_b[0])                              # (Bb*T, lb_group*H)
    out_ref[0] = out_g.reshape(Bb, T, GH).astype(out_ref.dtype)


def _physical_vmem_bytes():
    """Physical VMEM capacity; conservative (v7x, 64 MiB) fallback if unavailable."""
    try:
        info = pltpu.get_tpu_info()
        for attr in ("vmem_capacity_bytes", "vmem_size_bytes", "vmem_bytes"):
            v = getattr(info, attr, None)
            if v:
                return int(v)
    except Exception:
        pass
    return 64 * 1024 * 1024


def tprompt_forward(token_embeds, entity_embeds, params, *,
                    hidden_size, n_layer, n_block, n_head, n_prefix_conv,
                    batch_block=None, lb_group=None,
                    matmul_dtype=jnp.float32, out_dtype=None):
    (tp1_w1, tp1_b1, tp1_w2, tp1_b2, tp2_w, tp2_b, ca_w,
     cpe, cp_w1, cp_b1, cp_w2, cp_b2,
     pp1_w1, pp1_b1, pp1_w2, pp1_b2, pp2_w, pp2_b) = params

    B, T, Th = token_embeds.shape
    _, E, H = entity_embeds.shape
    assert H == hidden_size
    Pc = n_prefix_conv
    LB = n_layer * n_block
    head_dim = H // n_head
    f32 = jnp.float32
    md = jnp.dtype(matmul_dtype)
    od = jnp.dtype(md if out_dtype is None else out_dtype)
    md_b = md.itemsize
    od_b = od.itemsize

    # ---- generation-aware VMEM budget (v7x: 64 MiB physical; v5e/v6e: 128 MiB) ----
    phys_vmem = _physical_vmem_bytes()
    vmem_limit = int(min(100 * 1024 * 1024, (phys_vmem * 3) // 4))  # ~48 MiB v7x, ~96 MiB else

    # ---- group the prompt_proj2 column axis (2 on v7x, up to 4 on v5e/v6e) ----
    if lb_group is None:
        cap = 2 if phys_vmem <= 96 * 1024 * 1024 else 4
        lb_group = 1
        for d in range(min(LB, cap), 0, -1):
            if LB % d == 0:
                lb_group = d
                break
    assert LB % lb_group == 0
    LG = LB // lb_group
    GH = lb_group * H

    # ---- one-time weight preprocessing (constant folds, done in the wrapper) ----
    ca_w_scaled = (ca_w / float(hidden_size)).astype(md)    # fold softmax 1/hidden scale
    # group prompt_proj2 columns: (H, LB*H) -> (LG, H, lb_group*H)
    pp2_w_t = jnp.transpose(pp2_w.reshape(H, LG, GH), (1, 0, 2)).astype(md)
    pp2_b_t = pp2_b.reshape(LG, 1, GH).astype(f32)

    # matmul weights in matmul_dtype (bf16 on v5e/v6e/v7x), biases stay f32
    weight_inputs = [tp1_w1.astype(md), tp1_b1.astype(f32),
                     tp1_w2.astype(md), tp1_b2.astype(f32),
                     tp2_w.astype(md), tp2_b.astype(f32),
                     ca_w_scaled,
                     pp1_w1.astype(md), pp1_b1.astype(f32),
                     pp1_w2.astype(md), pp1_b2.astype(f32)]
    weight_bytes = sum(int(w.size) * w.dtype.itemsize for w in weight_inputs)

    # ---- budget-driven batch_block: Bb*T targeted at ~512 rows, VMEM permitting ----
    def _est_vmem(bb):
        stream = 2 * bb * (T * Th + E * H) * md_b        # double-buffered tok + ent
        outb = 2 * bb * T * GH * od_b                    # double-buffered output tile
        pp2 = 2 * (GH * H * md_b + GH * 4)               # pp2 weight/bias tiles
        scratch = bb * T * H * md_b                      # full2 carry scratch
        temps = bb * T * (E + 2 * Th + 4 * H) * 4        # f32 intermediates headroom
        return 2 * weight_bytes + stream + outb + pp2 + scratch + temps

    if batch_block is None:
        budget = (vmem_limit * 4) // 5
        target_rows = 512
        divisors = [d for d in range(1, B + 1) if B % d == 0]
        fitting = [d for d in divisors if _est_vmem(d) <= budget]
        if not fitting:
            batch_block = 1
        else:
            row_ok = [d for d in fitting if d * T <= max(target_rows, T)]
            batch_block = max(row_ok) if row_ok else min(fitting)
    # TODO(synk): if B is prime and large, batch_block falls back to 1 (perf cliff);
    # padding the batch to a composite size in the wrapper would remove it.
    assert B % batch_block == 0
    NB = B // batch_block

    # ---- batch-invariant conv-prefix path hoisted entirely out of the kernel ----
    cpe32 = cpe.astype(f32)
    pref = jnp.maximum(cpe32 @ cp_w1 + cp_b1, 0.0) @ cp_w2 + cp_b2 + cpe32     # (Pc, H)
    pref = jnp.maximum(pref @ pp1_w1 + pp1_b1, 0.0) @ pp1_w2 + pp1_b2 + pref   # (Pc, H)
    pref_out = (pref @ pp2_w + pp2_b).reshape(Pc, n_layer, n_block, n_head, head_dim)
    pref_out = jnp.transpose(pref_out, (1, 2, 3, 0, 4))          # (nl, nb, nh, Pc, hd)
    pref_out = jnp.broadcast_to(
        pref_out[:, :, None], (n_layer, n_block, B, n_head, Pc, head_dim)).astype(od)

    # ---- inputs streamed in matmul dtype (halves HBM->VMEM bytes when bf16) ----
    tok_in = token_embeds.astype(md)
    ent_in = entity_embeds.astype(md)

    flops = int(2 * B * T * (Th * (Th // 2) * 2 + Th * H + H * H + 2 * E * H
                             + H * (H // 2) * 2 + H * LB * H))
    transc = int(B * T * (E + 1))
    bytes_acc = int(tok_in.size * md_b + ent_in.size * md_b + weight_bytes
                    + int(pp2_w_t.size) * md_b + int(pp2_b_t.size) * 4
                    + LG * B * T * GH * od_b)

    kern = functools.partial(_tprompt_kernel, md)

    def _call(single_buffer_weights):
        def inv_spec(arr):
            # grid-invariant weights: single-buffer to reclaim VMEM (default is 2x)
            kwargs = {"pipeline_mode": pl.Buffered(1)} if single_buffer_weights else {}
            return pl.BlockSpec(arr.shape, lambda b, g: (0,) * arr.ndim, **kwargs)

        in_specs = (
            [pl.BlockSpec((batch_block, T, Th), lambda b, g: (b, 0, 0)),
             pl.BlockSpec((batch_block, E, H), lambda b, g: (b, 0, 0))]
            + [inv_spec(w) for w in weight_inputs]
            + [pl.BlockSpec((1, H, GH), lambda b, g: (g, 0, 0)),
               pl.BlockSpec((1, 1, GH), lambda b, g: (g, 0, 0))])

        return pl.pallas_call(
            kern,
            out_shape=jax.ShapeDtypeStruct((LG, B, T, GH), od),
            grid=(NB, LG),
            in_specs=in_specs,
            out_specs=pl.BlockSpec((1, batch_block, T, GH), lambda b, g: (g, b, 0, 0)),
            scratch_shapes=[pltpu.VMEM((batch_block * T, H), md)],
            compiler_params=pltpu.CompilerParams(
                dimension_semantics=("parallel", "arbitrary"),
                vmem_limit_bytes=vmem_limit),
            cost_estimate=pl.CostEstimate(
                flops=flops, transcendentals=transc, bytes_accessed=bytes_acc),
        )(tok_in, ent_in, *weight_inputs, pp2_w_t, pp2_b_t)

    try:
        out = _call(True)      # single-buffer the grid-invariant weight inputs
    except Exception:
        out = _call(False)     # fallback if this JAX rejects BlockSpec pipeline_mode

    # (LG, B, T, lb_group*H) -> (n_layer, n_block, B, n_head, T, head_dim)
    out = out.reshape(LG, B, T, lb_group, n_head, head_dim)
    out = jnp.transpose(out, (0, 3, 1, 4, 2, 5))
    out = out.reshape(n_layer, n_block, B, n_head, T, head_dim)

    # stitch the batch-invariant prefix rows in front of the prompt rows (P axis)
    return jnp.concatenate([pref_out, out], axis=4)


def _reference(token_embeds, entity_embeds, params, *,
               hidden_size, n_layer, n_block, n_head, n_prefix_conv):
    """Pure-JAX reference of the torch forward (for correctness check)."""
    (tp1_w1, tp1_b1, tp1_w2, tp1_b2, tp2_w, tp2_b, ca_w,
     cpe, cp_w1, cp_b1, cp_w2, cp_b2,
     pp1_w1, pp1_b1, pp1_w2, pp1_b2, pp2_w, pp2_b) = params
    tok = token_embeds
    ent = entity_embeds
    tok = jnp.maximum(tok @ tp1_w1 + tp1_b1, 0.0) @ tp1_w2 + tp1_b2 + tok
    tok = tok @ tp2_w + tp2_b
    attn = (tok @ ca_w) @ jnp.swapaxes(ent, 1, 2) / hidden_size
    w = jax.nn.softmax(attn, axis=2)
    prompt = w @ ent + tok
    prefix = jnp.maximum(cpe @ cp_w1 + cp_b1, 0.0) @ cp_w2 + cp_b2 + cpe
    prefix = jnp.broadcast_to(prefix[None], (tok.shape[0],) + prefix.shape)
    full = jnp.concatenate([prefix, prompt], axis=1)
    full = jnp.maximum(full @ pp1_w1 + pp1_b1, 0.0) @ pp1_w2 + pp1_b2 + full
    out = full @ pp2_w + pp2_b
    B, P = out.shape[:2]
    head_dim = hidden_size // n_head
    out = out.reshape(B, P, n_layer, n_block, n_head, head_dim)
    return jnp.transpose(out, (2, 3, 0, 4, 1, 5))


if __name__ == "__main__":
    # Small, module-consistent shapes.
    hidden_size = 32
    token_hidden_size = 64
    n_head = 4
    n_layer = 2
    n_block = 2
    n_prefix_conv = 4
    B, T, E = 2, 8, 8

    key = jax.random.PRNGKey(0)
    keys = jax.random.split(key, 32)
    kit = iter(keys)

    def nrm(shape, scale=0.05):
        return scale * jax.random.normal(next(kit), shape, dtype=jnp.float32)

    H, Th = hidden_size, token_hidden_size
    params = [
        nrm((Th, Th // 2)), nrm((1, Th // 2)),            # token_proj1 linear 1
        nrm((Th // 2, Th)), nrm((1, Th)),                 # token_proj1 linear 2
        nrm((Th, H)), nrm((1, H)),                        # token_proj2
        nrm((H, H)),                                      # cross_attn (no bias)
        jax.random.normal(next(kit), (n_prefix_conv, H), dtype=jnp.float32),  # conv_prefix_embeds
        nrm((H, H // 2)), nrm((1, H // 2)),               # conv_prefix_proj linear 1
        nrm((H // 2, H)), nrm((1, H)),                    # conv_prefix_proj linear 2
        nrm((H, H // 2)), nrm((1, H // 2)),               # prompt_proj1 linear 1
        nrm((H // 2, H)), nrm((1, H)),                    # prompt_proj1 linear 2
        nrm((H, n_layer * n_block * H)), nrm((1, n_layer * n_block * H)),  # prompt_proj2
    ]

    token_embeds = jax.random.normal(next(kit), (B, T, Th), dtype=jnp.float32)
    entity_embeds = jax.random.normal(next(kit), (B, E, H), dtype=jnp.float32)

    cfg = dict(hidden_size=hidden_size, n_layer=n_layer, n_block=n_block,
               n_head=n_head, n_prefix_conv=n_prefix_conv)

    # f32 path: exact-ish check against the pure-JAX reference.
    out = tprompt_forward(token_embeds, entity_embeds, params, **cfg)
    out = jax.block_until_ready(out)

    ref = _reference(token_embeds, entity_embeds, params, **cfg)
    assert out.shape == (n_layer, n_block, B, n_head, T + n_prefix_conv,
                         hidden_size // n_head)
    # 1e-3 tolerance: pl.reciprocal(approx=True) in the softmax introduces ~2e-4
    # relative deviation vs the exact reference.
    np.testing.assert_allclose(np.asarray(out), np.asarray(ref), rtol=1e-3, atol=1e-3)

    # bf16 streaming path (production config on v5e/v6e/v7x): bf16 inputs, scratch
    # and kernel output; verify it runs and produces finite values.
    out_bf16 = tprompt_forward(token_embeds, entity_embeds, params, **cfg,
                               matmul_dtype=jnp.bfloat16)
    out_bf16 = jax.block_until_ready(out_bf16)
    assert out_bf16.dtype == jnp.bfloat16
    assert bool(jnp.all(jnp.isfinite(out_bf16.astype(jnp.float32))))

    print("KERNEL_OK")
</pallas_src>

<mosaic_0001>
module attributes {stable_mosaic.version = 11 : i64} {
  func.func @_tprompt_kernel(%arg0: i32, %arg1: i32, %arg2: memref<2x8x64xf32, #tpu.memory_space<vmem>>, %arg3: memref<2x8x32xf32, #tpu.memory_space<vmem>>, %arg4: memref<64x32xf32, #tpu.memory_space<vmem>>, %arg5: memref<1x32xf32, #tpu.memory_space<vmem>>, %arg6: memref<32x64xf32, #tpu.memory_space<vmem>>, %arg7: memref<1x64xf32, #tpu.memory_space<vmem>>, %arg8: memref<64x32xf32, #tpu.memory_space<vmem>>, %arg9: memref<1x32xf32, #tpu.memory_space<vmem>>, %arg10: memref<32x32xf32, #tpu.memory_space<vmem>>, %arg11: memref<32x16xf32, #tpu.memory_space<vmem>>, %arg12: memref<1x16xf32, #tpu.memory_space<vmem>>, %arg13: memref<16x32xf32, #tpu.memory_space<vmem>>, %arg14: memref<1x32xf32, #tpu.memory_space<vmem>>, %arg15: memref<1x32x64xf32, #tpu.memory_space<vmem>>, %arg16: memref<1x1x64xf32, #tpu.memory_space<vmem>>, %arg17: memref<1x2x8x64xf32, #tpu.memory_space<vmem>>, %arg18: memref<16x32xf32, #tpu.memory_space<vmem>>) attributes {dimension_semantics = [#tpu.dimension_semantics<parallel>, #tpu.dimension_semantics<arbitrary>], iteration_bounds = array<i64: 1, 2>, scalar_prefetch = 0 : i64, scratch_operands = 1 : i64, tpu.core_type = #tpu.core_type<tc>, window_params = [{transform_indices = @transform_0, window_bounds = array<i64: 2, 8, 64>}, {transform_indices = @transform_1, window_bounds = array<i64: 2, 8, 32>}, {pipeline_mode = #tpu.pipeline_mode<synchronous>, transform_indices = @transform_2, window_bounds = array<i64: 64, 32>}, {pipeline_mode = #tpu.pipeline_mode<synchronous>, transform_indices = @transform_3, window_bounds = array<i64: 1, 32>}, {pipeline_mode = #tpu.pipeline_mode<synchronous>, transform_indices = @transform_4, window_bounds = array<i64: 32, 64>}, {pipeline_mode = #tpu.pipeline_mode<synchronous>, transform_indices = @transform_5, window_bounds = array<i64: 1, 64>}, {pipeline_mode = #tpu.pipeline_mode<synchronous>, transform_indices = @transform_6, window_bounds = array<i64: 64, 32>}, {pipeline_mode = #tpu.pipeline_mode<synchronous>, transform_indices = @transform_7, window_bounds = array<i64: 1, 32>}, {pipeline_mode = #tpu.pipeline_mode<synchronous>, transform_indices = @transform_8, window_bounds = array<i64: 32, 32>}, {pipeline_mode = #tpu.pipeline_mode<synchronous>, transform_indices = @transform_9, window_bounds = array<i64: 32, 16>}, {pipeline_mode = #tpu.pipeline_mode<synchronous>, transform_indices = @transform_10, window_bounds = array<i64: 1, 16>}, {pipeline_mode = #tpu.pipeline_mode<synchronous>, transform_indices = @transform_11, window_bounds = array<i64: 16, 32>}, {pipeline_mode = #tpu.pipeline_mode<synchronous>, transform_indices = @transform_12, window_bounds = array<i64: 1, 32>}, {transform_indices = @transform_13, window_bounds = array<i64: 1, 32, 64>}, {transform_indices = @transform_14, window_bounds = array<i64: 1, 1, 64>}, {transform_indices = @transform_15, window_bounds = array<i64: 1, 2, 8, 64>}]} {
    %c0_i32 = arith.constant 0 : i32
    %0 = arith.cmpi eq, %arg1, %c0_i32 : i32
    %1 = arith.extui %0 : i1 to i32
    %c0_i32_0 = arith.constant 0 : i32
    %2 = arith.cmpi ne, %1, %c0_i32_0 : i32
    scf.if %2 {
      %c0_12 = arith.constant 0 : index
      %c0_13 = arith.constant 0 : index
      %c0_14 = arith.constant 0 : index
      %15 = vector.load %arg2[%c0_12, %c0_13, %c0_14] : memref<2x8x64xf32, #tpu.memory_space<vmem>>, vector<2x8x64xf32>
      %16 = vector.shape_cast %15 : vector<2x8x64xf32> to vector<16x64xf32>
      %c0_15 = arith.constant 0 : index
      %c0_16 = arith.constant 0 : index
      %c0_17 = arith.constant 0 : index
      %17 = vector.load %arg3[%c0_15, %c0_16, %c0_17] : memref<2x8x32xf32, #tpu.memory_space<vmem>>, vector<2x8x32xf32>
      %c0_18 = arith.constant 0 : index
      %c0_19 = arith.constant 0 : index
      %18 = vector.load %arg4[%c0_18, %c0_19] : memref<64x32xf32, #tpu.memory_space<vmem>>, vector<64x32xf32>
      %cst_20 = arith.constant dense<0.000000e+00> : vector<16x32xf32>
      %19 = tpu.matmul %16, %18, %cst_20 {dimension_numbers = #tpu.dot_dimension_numbers<[1], [0], [0], [1], [0, 0, 1, 1], [], []>} : vector<16x64xf32>, vector<64x32xf32>, vector<16x32xf32> -> vector<16x32xf32>
      %c0_21 = arith.constant 0 : index
      %c0_22 = arith.constant 0 : index
      %20 = vector.load %arg5[%c0_21, %c0_22] : memref<1x32xf32, #tpu.memory_space<vmem>>, vector<1x32xf32>
      %21 = vector.broadcast %20 : vector<1x32xf32> to vector<16x32xf32>
      %22 = arith.addf %19, %21 : vector<16x32xf32>
      %cst_23 = arith.constant 0.000000e+00 : f32
      %23 = vector.broadcast %cst_23 : f32 to vector<16x32xf32>
      %24 = arith.maximumf %22, %23 : vector<16x32xf32>
      %c0_24 = arith.constant 0 : index
      %c0_25 = arith.constant 0 : index
      %25 = vector.load %arg6[%c0_24, %c0_25] : memref<32x64xf32, #tpu.memory_space<vmem>>, vector<32x64xf32>
      %cst_26 = arith.constant dense<0.000000e+00> : vector<16x64xf32>
      %26 = tpu.matmul %24, %25, %cst_26 {dimension_numbers = #tpu.dot_dimension_numbers<[1], [0], [0], [1], [0, 0, 1, 1], [], []>} : vector<16x32xf32>, vector<32x64xf32>, vector<16x64xf32> -> vector<16x64xf32>
      %c0_27 = arith.constant 0 : index
      %c0_28 = arith.constant 0 : index
      %27 = vector.load %arg7[%c0_27, %c0_28] : memref<1x64xf32, #tpu.memory_space<vmem>>, vector<1x64xf32>
      %28 = vector.broadcast %27 : vector<1x64xf32> to vector<16x64xf32>
      %29 = arith.addf %26, %28 : vector<16x64xf32>
      %30 = arith.addf %29, %16 : vector<16x64xf32>
      %c0_29 = arith.constant 0 : index
      %c0_30 = arith.constant 0 : index
      %31 = vector.load %arg8[%c0_29, %c0_30] : memref<64x32xf32, #tpu.memory_space<vmem>>, vector<64x32xf32>
      %cst_31 = arith.constant dense<0.000000e+00> : vector<16x32xf32>
      %32 = tpu.matmul %30, %31, %cst_31 {dimension_numbers = #tpu.dot_dimension_numbers<[1], [0], [0], [1], [0, 0, 1, 1], [], []>} : vector<16x64xf32>, vector<64x32xf32>, vector<16x32xf32> -> vector<16x32xf32>
      %c0_32 = arith.constant 0 : index
      %c0_33 = arith.constant 0 : index
      %33 = vector.load %arg9[%c0_32, %c0_33] : memref<1x32xf32, #tpu.memory_space<vmem>>, vector<1x32xf32>
      %34 = vector.broadcast %33 : vector<1x32xf32> to vector<16x32xf32>
      %35 = arith.addf %32, %34 : vector<16x32xf32>
      %c0_34 = arith.constant 0 : index
      %c0_35 = arith.constant 0 : index
      %36 = vector.load %arg10[%c0_34, %c0_35] : memref<32x32xf32, #tpu.memory_space<vmem>>, vector<32x32xf32>
      %cst_36 = arith.constant dense<0.000000e+00> : vector<16x32xf32>
      %37 = tpu.matmul %35, %36, %cst_36 {dimension_numbers = #tpu.dot_dimension_numbers<[1], [0], [0], [1], [0, 0, 1, 1], [], []>} : vector<16x32xf32>, vector<32x32xf32>, vector<16x32xf32> -> vector<16x32xf32>
      %38 = vector.shape_cast %37 : vector<16x32xf32> to vector<2x8x32xf32>
      %cst_37 = arith.constant dense<0.000000e+00> : vector<2x8x8xf32>
      %39 = tpu.matmul %38, %17, %cst_37 {dimension_numbers = #tpu.dot_dimension_numbers<[2], [2], [1], [1], [0, 0, 0, 1, 1, 1], [0], [0]>} : vector<2x8x32xf32>, vector<2x8x32xf32>, vector<2x8x8xf32> -> vector<2x8x8xf32>
      %cst_38 = arith.constant dense<0xFF800000> : vector<2x8xf32>
      %40 = vector.multi_reduction <maximumf>, %39, %cst_38 [2] : vector<2x8x8xf32> to vector<2x8xf32>
      %41 = vector.shape_cast %40 : vector<2x8xf32> to vector<2x8x1xf32>
      %42 = vector.broadcast %41 : vector<2x8x1xf32> to vector<2x8x8xf32>
      %43 = arith.subf %39, %42 : vector<2x8x8xf32>
      %44 = math.exp %43 : vector<2x8x8xf32>
      %cst_39 = arith.constant dense<0.000000e+00> : vector<2x8xf32>
      %45 = vector.multi_reduction <add>, %44, %cst_39 [2] : vector<2x8x8xf32> to vector<2x8xf32>
      %46 = vector.shape_cast %45 : vector<2x8xf32> to vector<2x8x1xf32>
      %47 = tpu.reciprocal %46 {approx = true} : vector<2x8x1xf32> -> vector<2x8x1xf32>
      %48 = vector.broadcast %47 : vector<2x8x1xf32> to vector<2x8x8xf32>
      %49 = arith.mulf %44, %48 : vector<2x8x8xf32>
      %cst_40 = arith.constant dense<0.000000e+00> : vector<2x8x32xf32>
      %50 = tpu.matmul %49, %17, %cst_40 {dimension_numbers = #tpu.dot_dimension_numbers<[2], [1], [1], [2], [0, 0, 0, 1, 1, 2], [0], [0]>} : vector<2x8x8xf32>, vector<2x8x32xf32>, vector<2x8x32xf32> -> vector<2x8x32xf32>
      %51 = vector.shape_cast %50 : vector<2x8x32xf32> to vector<16x32xf32>
      %52 = arith.addf %51, %35 : vector<16x32xf32>
      %c0_41 = arith.constant 0 : index
      %c0_42 = arith.constant 0 : index
      %53 = vector.load %arg11[%c0_41, %c0_42] : memref<32x16xf32, #tpu.memory_space<vmem>>, vector<32x16xf32>
      %cst_43 = arith.constant dense<0.000000e+00> : vector<16x16xf32>
      %54 = tpu.matmul %52, %53, %cst_43 {dimension_numbers = #tpu.dot_dimension_numbers<[1], [0], [0], [1], [0, 0, 1, 1], [], []>} : vector<16x32xf32>, vector<32x16xf32>, vector<16x16xf32> -> vector<16x16xf32>
      %c0_44 = arith.constant 0 : index
      %c0_45 = arith.constant 0 : index
      %55 = vector.load %arg12[%c0_44, %c0_45] : memref<1x16xf32, #tpu.memory_space<vmem>>, vector<1x16xf32>
      %56 = vector.broadcast %55 : vector<1x16xf32> to vector<16x16xf32>
      %57 = arith.addf %54, %56 : vector<16x16xf32>
      %cst_46 = arith.constant 0.000000e+00 : f32
      %58 = vector.broadcast %cst_46 : f32 to vector<16x16xf32>
      %59 = arith.maximumf %57, %58 : vector<16x16xf32>
      %c0_47 = arith.constant 0 : index
      %c0_48 = arith.constant 0 : index
      %60 = vector.load %arg13[%c0_47, %c0_48] : memref<16x32xf32, #tpu.memory_space<vmem>>, vector<16x32xf32>
      %cst_49 = arith.constant dense<0.000000e+00> : vector<16x32xf32>
      %61 = tpu.matmul %59, %60, %cst_49 {dimension_numbers = #tpu.dot_dimension_numbers<[1], [0], [0], [1], [0, 0, 1, 1], [], []>} : vector<16x16xf32>, vector<16x32xf32>, vector<16x32xf32> -> vector<16x32xf32>
      %c0_50 = arith.constant 0 : index
      %c0_51 = arith.constant 0 : index
      %62 = vector.load %arg14[%c0_50, %c0_51] : memref<1x32xf32, #tpu.memory_space<vmem>>, vector<1x32xf32>
      %63 = vector.broadcast %62 : vector<1x32xf32> to vector<16x32xf32>
      %64 = arith.addf %61, %63 : vector<16x32xf32>
      %65 = arith.addf %64, %52 : vector<16x32xf32>
      %c0_52 = arith.constant 0 : index
      %c0_53 = arith.constant 0 : index
      %66 = vector.load %arg18[%c0_52, %c0_53] : memref<16x32xf32, #tpu.memory_space<vmem>>, vector<16x32xf32>
      tpu.vector_store %arg18[%c0_52, %c0_53], %65 {strides = array<i32>} : memref<16x32xf32, #tpu.memory_space<vmem>>, vector<16x32xf32>,
    } else {
    }
    %c0 = arith.constant 0 : index
    %c0_1 = arith.constant 0 : index
    %3 = vector.load %arg18[%c0, %c0_1] : memref<16x32xf32, #tpu.memory_space<vmem>>, vector<16x32xf32>
    %c0_2 = arith.constant 0 : index
    %c0_3 = arith.constant 0 : index
    %c0_4 = arith.constant 0 : index
    %4 = vector.load %arg15[%c0_2, %c0_3, %c0_4] : memref<1x32x64xf32, #tpu.memory_space<vmem>>, vector<1x32x64xf32>
    %5 = vector.shape_cast %4 : vector<1x32x64xf32> to vector<32x64xf32>
    %cst = arith.constant dense<0.000000e+00> : vector<16x64xf32>
    %6 = tpu.matmul %3, %5, %cst {dimension_numbers = #tpu.dot_dimension_numbers<[1], [0], [0], [1], [0, 0, 1, 1], [], []>} : vector<16x32xf32>, vector<32x64xf32>, vector<16x64xf32> -> vector<16x64xf32>
    %c0_5 = arith.constant 0 : index
    %c0_6 = arith.constant 0 : index
    %c0_7 = arith.constant 0 : index
    %7 = vector.load %arg16[%c0_5, %c0_6, %c0_7] : memref<1x1x64xf32, #tpu.memory_space<vmem>>, vector<1x1x64xf32>
    %8 = vector.shape_cast %7 : vector<1x1x64xf32> to vector<1x64xf32>
    %9 = vector.broadcast %8 : vector<1x64xf32> to vector<16x64xf32>
    %10 = arith.addf %6, %9 : vector<16x64xf32>
    %11 = vector.shape_cast %10 : vector<16x64xf32> to vector<2x8x64xf32>
    %c0_8 = arith.constant 0 : index
    %c0_9 = arith.constant 0 : index
    %c0_10 = arith.constant 0 : index
    %c0_11 = arith.constant 0 : index
    %12 = vector.load %arg17[%c0_8, %c0_9, %c0_10, %c0_11] : memref<1x2x8x64xf32, #tpu.memory_space<vmem>>, vector<1x2x8x64xf32>
    %13 = vector.shape_cast %12 : vector<1x2x8x64xf32> to vector<2x8x64xf32>
    %14 = vector.shape_cast %11 : vector<2x8x64xf32> to vector<1x2x8x64xf32>
    tpu.vector_store %arg17[%c0_8, %c0_9, %c0_10, %c0_11], %14 {strides = array<i32>} : memref<1x2x8x64xf32, #tpu.memory_space<vmem>>, vector<1x2x8x64xf32>,
    return
  }
  func.func @transform_0(%arg0: i32, %arg1: i32) -> (i32, i32, i32) {
    %c0_i32 = arith.constant 0 : i32
    %c0_i32_0 = arith.constant 0 : i32
    %c0_i32_1 = arith.constant 0 : i32
    return %arg0, %c0_i32, %c0_i32_0 : i32, i32, i32
  }
  func.func @transform_1(%arg0: i32, %arg1: i32) -> (i32, i32, i32) {
    %c0_i32 = arith.constant 0 : i32
    %c0_i32_0 = arith.constant 0 : i32
    %c0_i32_1 = arith.constant 0 : i32
    return %arg0, %c0_i32, %c0_i32_0 : i32, i32, i32
  }
  func.func @transform_2(%arg0: i32, %arg1: i32) -> (i32, i32) {
    %c0_i32 = arith.constant 0 : i32
    %c0_i32_0 = arith.constant 0 : i32
    %c0_i32_1 = arith.constant 0 : i32
    return %c0_i32, %c0_i32_0 : i32, i32
  }
  func.func @transform_3(%arg0: i32, %arg1: i32) -> (i32, i32) {
    %c0_i32 = arith.constant 0 : i32
    %c0_i32_0 = arith.constant 0 : i32
    %c0_i32_1 = arith.constant 0 : i32
    return %c0_i32, %c0_i32_0 : i32, i32
  }
  func.func @transform_4(%arg0: i32, %arg1: i32) -> (i32, i32) {
    %c0_i32 = arith.constant 0 : i32
    %c0_i32_0 = arith.constant 0 : i32
    %c0_i32_1 = arith.constant 0 : i32
    return %c0_i32, %c0_i32_0 : i32, i32
  }
  func.func @transform_5(%arg0: i32, %arg1: i32) -> (i32, i32) {
    %c0_i32 = arith.constant 0 : i32
    %c0_i32_0 = arith.constant 0 : i32
    %c0_i32_1 = arith.constant 0 : i32
    return %c0_i32, %c0_i32_0 : i32, i32
  }
  func.func @transform_6(%arg0: i32, %arg1: i32) -> (i32, i32) {
    %c0_i32 = arith.constant 0 : i32
    %c0_i32_0 = arith.constant 0 : i32
    %c0_i32_1 = arith.constant 0 : i32
    return %c0_i32, %c0_i32_0 : i32, i32
  }
  func.func @transform_7(%arg0: i32, %arg1: i32) -> (i32, i32) {
    %c0_i32 = arith.constant 0 : i32
    %c0_i32_0 = arith.constant 0 : i32
    %c0_i32_1 = arith.constant 0 : i32
    return %c0_i32, %c0_i32_0 : i32, i32
  }
  func.func @transform_8(%arg0: i32, %arg1: i32) -> (i32, i32) {
    %c0_i32 = arith.constant 0 : i32
    %c0_i32_0 = arith.constant 0 : i32
    %c0_i32_1 = arith.constant 0 : i32
    return %c0_i32, %c0_i32_0 : i32, i32
  }
  func.func @transform_9(%arg0: i32, %arg1: i32) -> (i32, i32) {
    %c0_i32 = arith.constant 0 : i32
    %c0_i32_0 = arith.constant 0 : i32
    %c0_i32_1 = arith.constant 0 : i32
    return %c0_i32, %c0_i32_0 : i32, i32
  }
  func.func @transform_10(%arg0: i32, %arg1: i32) -> (i32, i32) {
    %c0_i32 = arith.constant 0 : i32
    %c0_i32_0 = arith.constant 0 : i32
    %c0_i32_1 = arith.constant 0 : i32
    return %c0_i32, %c0_i32_0 : i32, i32
  }
  func.func @transform_11(%arg0: i32, %arg1: i32) -> (i32, i32) {
    %c0_i32 = arith.constant 0 : i32
    %c0_i32_0 = arith.constant 0 : i32
    %c0_i32_1 = arith.constant 0 : i32
    return %c0_i32, %c0_i32_0 : i32, i32
  }
  func.func @transform_12(%arg0: i32, %arg1: i32) -> (i32, i32) {
    %c0_i32 = arith.constant 0 : i32
    %c0_i32_0 = arith.constant 0 : i32
    %c0_i32_1 = arith.constant 0 : i32
    return %c0_i32, %c0_i32_0 : i32, i32
  }
  func.func @transform_13(%arg0: i32, %arg1: i32) -> (i32, i32, i32) {
    %c0_i32 = arith.constant 0 : i32
    %c0_i32_0 = arith.constant 0 : i32
    %c0_i32_1 = arith.constant 0 : i32
    return %arg1, %c0_i32, %c0_i32_0 : i32, i32, i32
  }
  func.func @transform_14(%arg0: i32, %arg1: i32) -> (i32, i32, i32) {
    %c0_i32 = arith.constant 0 : i32
    %c0_i32_0 = arith.constant 0 : i32
    %c0_i32_1 = arith.constant 0 : i32
    return %arg1, %c0_i32, %c0_i32_0 : i32, i32, i32
  }
  func.func @transform_15(%arg0: i32, %arg1: i32) -> (i32, i32, i32, i32) {
    %c0_i32 = arith.constant 0 : i32
    %c0_i32_0 = arith.constant 0 : i32
    %c0_i32_1 = arith.constant 0 : i32
    return %arg1, %arg0, %c0_i32, %c0_i32_0 : i32, i32, i32, i32
  }
}

module attributes {stable_mosaic.version = 11 : i64} {
  func.func @_tprompt_kernel(%arg0: i32, %arg1: i32, %arg2: memref<2x8x64xf32, #tpu.memory_space<vmem>>, %arg3: memref<2x8x32xf32, #tpu.memory_space<vmem>>, %arg4: memref<64x32xf32, #tpu.memory_space<vmem>>, %arg5: memref<1x32xf32, #tpu.memory_space<vmem>>, %arg6: memref<32x64xf32, #tpu.memory_space<vmem>>, %arg7: memref<1x64xf32, #tpu.memory_space<vmem>>, %arg8: memref<64x32xf32, #tpu.memory_space<vmem>>, %arg9: memref<1x32xf32, #tpu.memory_space<vmem>>, %arg10: memref<32x32xf32, #tpu.memory_space<vmem>>, %arg11: memref<32x16xf32, #tpu.memory_space<vmem>>, %arg12: memref<1x16xf32, #tpu.memory_space<vmem>>, %arg13: memref<16x32xf32, #tpu.memory_space<vmem>>, %arg14: memref<1x32xf32, #tpu.memory_space<vmem>>, %arg15: memref<1x32x64xf32, #tpu.memory_space<vmem>>, %arg16: memref<1x1x64xf32, #tpu.memory_space<vmem>>, %arg17: memref<1x2x8x64xf32, #tpu.memory_space<vmem>>, %arg18: memref<16x32xf32, #tpu.memory_space<vmem>>) attributes {dimension_semantics = [#tpu.dimension_semantics<parallel>, #tpu.dimension_semantics<arbitrary>], iteration_bounds = array<i64: 1, 2>, scalar_prefetch = 0 : i64, scratch_operands = 1 : i64, tpu.core_type = #tpu.core_type<tc>, window_params = [{transform_indices = @transform_0, window_bounds = array<i64: 2, 8, 64>}, {transform_indices = @transform_1, window_bounds = array<i64: 2, 8, 32>}, {pipeline_mode = #tpu.pipeline_mode<synchronous>, transform_indices = @transform_2, window_bounds = array<i64: 64, 32>}, {pipeline_mode = #tpu.pipeline_mode<synchronous>, transform_indices = @transform_3, window_bounds = array<i64: 1, 32>}, {pipeline_mode = #tpu.pipeline_mode<synchronous>, transform_indices = @transform_4, window_bounds = array<i64: 32, 64>}, {pipeline_mode = #tpu.pipeline_mode<synchronous>, transform_indices = @transform_5, window_bounds = array<i64: 1, 64>}, {pipeline_mode = #tpu.pipeline_mode<synchronous>, transform_indices = @transform_6, window_bounds = array<i64: 64, 32>}, {pipeline_mode = #tpu.pipeline_mode<synchronous>, transform_indices = @transform_7, window_bounds = array<i64: 1, 32>}, {pipeline_mode = #tpu.pipeline_mode<synchronous>, transform_indices = @transform_8, window_bounds = array<i64: 32, 32>}, {pipeline_mode = #tpu.pipeline_mode<synchronous>, transform_indices = @transform_9, window_bounds = array<i64: 32, 16>}, {pipeline_mode = #tpu.pipeline_mode<synchronous>, transform_indices = @transform_10, window_bounds = array<i64: 1, 16>}, {pipeline_mode = #tpu.pipeline_mode<synchronous>, transform_indices = @transform_11, window_bounds = array<i64: 16, 32>}, {pipeline_mode = #tpu.pipeline_mode<synchronous>, transform_indices = @transform_12, window_bounds = array<i64: 1, 32>}, {transform_indices = @transform_13, window_bounds = array<i64: 1, 32, 64>}, {transform_indices = @transform_14, window_bounds = array<i64: 1, 1, 64>}, {transform_indices = @transform_15, window_bounds = array<i64: 1, 2, 8, 64>}]} {
    %c0_i32 = arith.constant 0 : i32
    %0 = arith.cmpi eq, %arg1, %c0_i32 : i32
    %1 = arith.extui %0 : i1 to i32
    %c0_i32_0 = arith.constant 0 : i32
    %2 = arith.cmpi ne, %1, %c0_i32_0 : i32
    scf.if %2 {
      %c0_12 = arith.constant 0 : index
      %c0_13 = arith.constant 0 : index
      %c0_14 = arith.constant 0 : index
      %15 = vector.load %arg2[%c0_12, %c0_13, %c0_14] : memref<2x8x64xf32, #tpu.memory_space<vmem>>, vector<2x8x64xf32>
      %16 = vector.shape_cast %15 : vector<2x8x64xf32> to vector<16x64xf32>
      %c0_15 = arith.constant 0 : index
      %c0_16 = arith.constant 0 : index
      %c0_17 = arith.constant 0 : index
      %17 = vector.load %arg3[%c0_15, %c0_16, %c0_17] : memref<2x8x32xf32, #tpu.memory_space<vmem>>, vector<2x8x32xf32>
      %c0_18 = arith.constant 0 : index
      %c0_19 = arith.constant 0 : index
      %18 = vector.load %arg4[%c0_18, %c0_19] : memref<64x32xf32, #tpu.memory_space<vmem>>, vector<64x32xf32>
      %cst_20 = arith.constant dense<0.000000e+00> : vector<16x32xf32>
      %19 = tpu.matmul %16, %18, %cst_20 {dimension_numbers = #tpu.dot_dimension_numbers<[1], [0], [0], [1], [0, 0, 1, 1], [], []>} : vector<16x64xf32>, vector<64x32xf32>, vector<16x32xf32> -> vector<16x32xf32>
      %c0_21 = arith.constant 0 : index
      %c0_22 = arith.constant 0 : index
      %20 = vector.load %arg5[%c0_21, %c0_22] : memref<1x32xf32, #tpu.memory_space<vmem>>, vector<1x32xf32>
      %21 = vector.broadcast %20 : vector<1x32xf32> to vector<16x32xf32>
      %22 = arith.addf %19, %21 : vector<16x32xf32>
      %cst_23 = arith.constant 0.000000e+00 : f32
      %23 = vector.broadcast %cst_23 : f32 to vector<16x32xf32>
      %24 = arith.maximumf %22, %23 : vector<16x32xf32>
      %c0_24 = arith.constant 0 : index
      %c0_25 = arith.constant 0 : index
      %25 = vector.load %arg6[%c0_24, %c0_25] : memref<32x64xf32, #tpu.memory_space<vmem>>, vector<32x64xf32>
      %cst_26 = arith.constant dense<0.000000e+00> : vector<16x64xf32>
      %26 = tpu.matmul %24, %25, %cst_26 {dimension_numbers = #tpu.dot_dimension_numbers<[1], [0], [0], [1], [0, 0, 1, 1], [], []>} : vector<16x32xf32>, vector<32x64xf32>, vector<16x64xf32> -> vector<16x64xf32>
      %c0_27 = arith.constant 0 : index
      %c0_28 = arith.constant 0 : index
      %27 = vector.load %arg7[%c0_27, %c0_28] : memref<1x64xf32, #tpu.memory_space<vmem>>, vector<1x64xf32>
      %28 = vector.broadcast %27 : vector<1x64xf32> to vector<16x64xf32>
      %29 = arith.addf %26, %28 : vector<16x64xf32>
      %30 = arith.addf %29, %16 : vector<16x64xf32>
      %c0_29 = arith.constant 0 : index
      %c0_30 = arith.constant 0 : index
      %31 = vector.load %arg8[%c0_29, %c0_30] : memref<64x32xf32, #tpu.memory_space<vmem>>, vector<64x32xf32>
      %cst_31 = arith.constant dense<0.000000e+00> : vector<16x32xf32>
      %32 = tpu.matmul %30, %31, %cst_31 {dimension_numbers = #tpu.dot_dimension_numbers<[1], [0], [0], [1], [0, 0, 1, 1], [], []>} : vector<16x64xf32>, vector<64x32xf32>, vector<16x32xf32> -> vector<16x32xf32>
      %c0_32 = arith.constant 0 : index
      %c0_33 = arith.constant 0 : index
      %33 = vector.load %arg9[%c0_32, %c0_33] : memref<1x32xf32, #tpu.memory_space<vmem>>, vector<1x32xf32>
      %34 = vector.broadcast %33 : vector<1x32xf32> to vector<16x32xf32>
      %35 = arith.addf %32, %34 : vector<16x32xf32>
      %c0_34 = arith.constant 0 : index
      %c0_35 = arith.constant 0 : index
      %36 = vector.load %arg10[%c0_34, %c0_35] : memref<32x32xf32, #tpu.memory_space<vmem>>, vector<32x32xf32>
      %cst_36 = arith.constant dense<0.000000e+00> : vector<16x32xf32>
      %37 = tpu.matmul %35, %36, %cst_36 {dimension_numbers = #tpu.dot_dimension_numbers<[1], [0], [0], [1], [0, 0, 1, 1], [], []>} : vector<16x32xf32>, vector<32x32xf32>, vector<16x32xf32> -> vector<16x32xf32>
      %38 = vector.shape_cast %37 : vector<16x32xf32> to vector<2x8x32xf32>
      %cst_37 = arith.constant dense<0.000000e+00> : vector<2x8x8xf32>
      %39 = tpu.matmul %38, %17, %cst_37 {dimension_numbers = #tpu.dot_dimension_numbers<[2], [2], [1], [1], [0, 0, 0, 1, 1, 1], [0], [0]>} : vector<2x8x32xf32>, vector<2x8x32xf32>, vector<2x8x8xf32> -> vector<2x8x8xf32>
      %cst_38 = arith.constant dense<0xFF800000> : vector<2x8xf32>
      %40 = vector.multi_reduction <maximumf>, %39, %cst_38 [2] : vector<2x8x8xf32> to vector<2x8xf32>
      %41 = vector.shape_cast %40 : vector<2x8xf32> to vector<2x8x1xf32>
      %42 = vector.broadcast %41 : vector<2x8x1xf32> to vector<2x8x8xf32>
      %43 = arith.subf %39, %42 : vector<2x8x8xf32>
      %44 = math.exp %43 : vector<2x8x8xf32>
      %cst_39 = arith.constant dense<0.000000e+00> : vector<2x8xf32>
      %45 = vector.multi_reduction <add>, %44, %cst_39 [2] : vector<2x8x8xf32> to vector<2x8xf32>
      %46 = vector.shape_cast %45 : vector<2x8xf32> to vector<2x8x1xf32>
      %47 = tpu.reciprocal %46 {approx = true} : vector<2x8x1xf32> -> vector<2x8x1xf32>
      %48 = vector.broadcast %47 : vector<2x8x1xf32> to vector<2x8x8xf32>
      %49 = arith.mulf %44, %48 : vector<2x8x8xf32>
      %cst_40 = arith.constant dense<0.000000e+00> : vector<2x8x32xf32>
      %50 = tpu.matmul %49, %17, %cst_40 {dimension_numbers = #tpu.dot_dimension_numbers<[2], [1], [1], [2], [0, 0, 0, 1, 1, 2], [0], [0]>} : vector<2x8x8xf32>, vector<2x8x32xf32>, vector<2x8x32xf32> -> vector<2x8x32xf32>
      %51 = vector.shape_cast %50 : vector<2x8x32xf32> to vector<16x32xf32>
      %52 = arith.addf %51, %35 : vector<16x32xf32>
      %c0_41 = arith.constant 0 : index
      %c0_42 = arith.constant 0 : index
      %53 = vector.load %arg11[%c0_41, %c0_42] : memref<32x16xf32, #tpu.memory_space<vmem>>, vector<32x16xf32>
      %cst_43 = arith.constant dense<0.000000e+00> : vector<16x16xf32>
      %54 = tpu.matmul %52, %53, %cst_43 {dimension_numbers = #tpu.dot_dimension_numbers<[1], [0], [0], [1], [0, 0, 1, 1], [], []>} : vector<16x32xf32>, vector<32x16xf32>, vector<16x16xf32> -> vector<16x16xf32>
      %c0_44 = arith.constant 0 : index
      %c0_45 = arith.constant 0 : index
      %55 = vector.load %arg12[%c0_44, %c0_45] : memref<1x16xf32, #tpu.memory_space<vmem>>, vector<1x16xf32>
      %56 = vector.broadcast %55 : vector<1x16xf32> to vector<16x16xf32>
      %57 = arith.addf %54, %56 : vector<16x16xf32>
      %cst_46 = arith.constant 0.000000e+00 : f32
      %58 = vector.broadcast %cst_46 : f32 to vector<16x16xf32>
      %59 = arith.maximumf %57, %58 : vector<16x16xf32>
      %c0_47 = arith.constant 0 : index
      %c0_48 = arith.constant 0 : index
      %60 = vector.load %arg13[%c0_47, %c0_48] : memref<16x32xf32, #tpu.memory_space<vmem>>, vector<16x32xf32>
      %cst_49 = arith.constant dense<0.000000e+00> : vector<16x32xf32>
      %61 = tpu.matmul %59, %60, %cst_49 {dimension_numbers = #tpu.dot_dimension_numbers<[1], [0], [0], [1], [0, 0, 1, 1], [], []>} : vector<16x16xf32>, vector<16x32xf32>, vector<16x32xf32> -> vector<16x32xf32>
      %c0_50 = arith.constant 0 : index
      %c0_51 = arith.constant 0 : index
      %62 = vector.load %arg14[%c0_50, %c0_51] : memref<1x32xf32, #tpu.memory_space<vmem>>, vector<1x32xf32>
      %63 = vector.broadcast %62 : vector<1x32xf32> to vector<16x32xf32>
      %64 = arith.addf %61, %63 : vector<16x32xf32>
      %65 = arith.addf %64, %52 : vector<16x32xf32>
      %c0_52 = arith.constant 0 : index
      %c0_53 = arith.constant 0 : index
      %66 = vector.load %arg18[%c0_52, %c0_53] : memref<16x32xf32, #tpu.memory_space<vmem>>, vector<16x32xf32>
      tpu.vector_store %arg18[%c0_52, %c0_53], %65 {strides = array<i32>} : memref<16x32xf32, #tpu.memory_space<vmem>>, vector<16x32xf32>,
    } else {
    }
    %c0 = arith.constant 0 : index
    %c0_1 = arith.constant 0 : index
    %3 = vector.load %arg18[%c0, %c0_1] : memref<16x32xf32, #tpu.memory_space<vmem>>, vector<16x32xf32>
    %c0_2 = arith.constant 0 : index
    %c0_3 = arith.constant 0 : index
    %c0_4 = arith.constant 0 : index
    %4 = vector.load %arg15[%c0_2, %c0_3, %c0_4] : memref<1x32x64xf32, #tpu.memory_space<vmem>>, vector<1x32x64xf32>
    %5 = vector.shape_cast %4 : vector<1x32x64xf32> to vector<32x64xf32>
    %cst = arith.constant dense<0.000000e+00> : vector<16x64xf32>
    %6 = tpu.matmul %3, %5, %cst {dimension_numbers = #tpu.dot_dimension_numbers<[1], [0], [0], [1], [0, 0, 1, 1], [], []>} : vector<16x32xf32>, vector<32x64xf32>, vector<16x64xf32> -> vector<16x64xf32>
    %c0_5 = arith.constant 0 : index
    %c0_6 = arith.constant 0 : index
    %c0_7 = arith.constant 0 : index
    %7 = vector.load %arg16[%c0_5, %c0_6, %c0_7] : memref<1x1x64xf32, #tpu.memory_space<vmem>>, vector<1x1x64xf32>
    %8 = vector.shape_cast %7 : vector<1x1x64xf32> to vector<1x64xf32>
    %9 = vector.broadcast %8 : vector<1x64xf32> to vector<16x64xf32>
    %10 = arith.addf %6, %9 : vector<16x64xf32>
    %11 = vector.shape_cast %10 : vector<16x64xf32> to vector<2x8x64xf32>
    %c0_8 = arith.constant 0 : index
    %c0_9 = arith.constant 0 : index
    %c0_10 = arith.constant 0 : index
    %c0_11 = arith.constant 0 : index
    %12 = vector.load %arg17[%c0_8, %c0_9, %c0_10, %c0_11] : memref<1x2x8x64xf32, #tpu.memory_space<vmem>>, vector<1x2x8x64xf32>
    %13 = vector.shape_cast %12 : vector<1x2x8x64xf32> to vector<2x8x64xf32>
    %14 = vector.shape_cast %11 : vector<2x8x64xf32> to vector<1x2x8x64xf32>
    tpu.vector_store %arg17[%c0_8, %c0_9, %c0_10, %c0_11], %14 {strides = array<i32>} : memref<1x2x8x64xf32, #tpu.memory_space<vmem>>, vector<1x2x8x64xf32>,
    return
  }
  func.func @transform_0(%arg0: i32, %arg1: i32) -> (i32, i32, i32) {
    %c0_i32 = arith.constant 0 : i32
    %c0_i32_0 = arith.constant 0 : i32
    %c0_i32_1 = arith.constant 0 : i32
    return %arg0, %c0_i32, %c0_i32_0 : i32, i32, i32
  }
  func.func @transform_1(%arg0: i32, %arg1: i32) -> (i32, i32, i32) {
    %c0_i32 = arith.constant 0 : i32
    %c0_i32_0 = arith.constant 0 : i32
    %c0_i32_1 = arith.constant 0 : i32
    return %arg0, %c0_i32, %c0_i32_0 : i32, i32, i32
  }
  func.func @transform_2(%arg0: i32, %arg1: i32) -> (i32, i32) {
    %c0_i32 = arith.constant 0 : i32
    %c0_i32_0 = arith.constant 0 : i32
    %c0_i32_1 = arith.constant 0 : i32
    return %c0_i32, %c0_i32_0 : i32, i32
  }
  func.func @transform_3(%arg0: i32, %arg1: i32) -> (i32, i32) {
    %c0_i32 = arith.constant 0 : i32
    %c0_i32_0 = arith.constant 0 : i32
    %c0_i32_1 = arith.constant 0 : i32
    return %c0_i32, %c0_i32_0 : i32, i32
  }
  func.func @transform_4(%arg0: i32, %arg1: i32) -> (i32, i32) {
    %c0_i32 = arith.constant 0 : i32
    %c0_i32_0 = arith.constant 0 : i32
    %c0_i32_1 = arith.constant 0 : i32
    return %c0_i32, %c0_i32_0 : i32, i32
  }
  func.func @transform_5(%arg0: i32, %arg1: i32) -> (i32, i32) {
    %c0_i32 = arith.constant 0 : i32
    %c0_i32_0 = arith.constant 0 : i32
    %c0_i32_1 = arith.constant 0 : i32
    return %c0_i32, %c0_i32_0 : i32, i32
  }
  func.func @transform_6(%arg0: i32, %arg1: i32) -> (i32, i32) {
    %c0_i32 = arith.constant 0 : i32
    %c0_i32_0 = arith.constant 0 : i32
    %c0_i32_1 = arith.constant 0 : i32
    return %c0_i32, %c0_i32_0 : i32, i32
  }
  func.func @transform_7(%arg0: i32, %arg1: i32) -> (i32, i32) {
    %c0_i32 = arith.constant 0 : i32
    %c0_i32_0 = arith.constant 0 : i32
    %c0_i32_1 = arith.constant 0 : i32
    return %c0_i32, %c0_i32_0 : i32, i32
  }
  func.func @transform_8(%arg0: i32, %arg1: i32) -> (i32, i32) {
    %c0_i32 = arith.constant 0 : i32
    %c0_i32_0 = arith.constant 0 : i32
    %c0_i32_1 = arith.constant 0 : i32
    return %c0_i32, %c0_i32_0 : i32, i32
  }
  func.func @transform_9(%arg0: i32, %arg1: i32) -> (i32, i32) {
    %c0_i32 = arith.constant 0 : i32
    %c0_i32_0 = arith.constant 0 : i32
    %c0_i32_1 = arith.constant 0 : i32
    return %c0_i32, %c0_i32_0 : i32, i32
  }
  func.func @transform_10(%arg0: i32, %arg1: i32) -> (i32, i32) {
    %c0_i32 = arith.constant 0 : i32
    %c0_i32_0 = arith.constant 0 : i32
    %c0_i32_1 = arith.constant 0 : i32
    return %c0_i32, %c0_i32_0 : i32, i32
  }
  func.func @transform_11(%arg0: i32, %arg1: i32) -> (i32, i32) {
    %c0_i32 = arith.constant 0 : i32
    %c0_i32_0 = arith.constant 0 : i32
    %c0_i32_1 = arith.constant 0 : i32
    return %c0_i32, %c0_i32_0 : i32, i32
  }
  func.func @transform_12(%arg0: i32, %arg1: i32) -> (i32, i32) {
    %c0_i32 = arith.constant 0 : i32
    %c0_i32_0 = arith.constant 0 : i32
    %c0_i32_1 = arith.constant 0 : i32
    return %c0_i32, %c0_i32_0 : i32, i32
  }
  func.func @transform_13(%arg0: i32, %arg1: i32) -> (i32, i32, i32) {
    %c0_i32 = arith.constant 0 : i32
    %c0_i32_0 = arith.constant 0 : i32
    %c0_i32_1 = arith.constant 0 : i32
    return %arg1, %c0_i32, %c0_i32_0 : i32, i32, i32
  }
  func.func @transform_14(%arg0: i32, %arg1: i32) -> (i32, i32, i32) {
    %c0_i32 = arith.constant 0 : i32
    %c0_i32_0 = arith.constant 0 : i32
    %c0_i32_1 = arith.constant 0 : i32
    return %arg1, %c0_i32, %c0_i32_0 : i32, i32, i32
  }
  func.func @transform_15(%arg0: i32, %arg1: i32) -> (i32, i32, i32, i32) {
    %c0_i32 = arith.constant 0 : i32
    %c0_i32_0 = arith.constant 0 : i32
    %c0_i32_1 = arith.constant 0 : i32
    return %arg1, %arg0, %c0_i32, %c0_i32_0 : i32, i32, i32, i32
  }
}

</mosaic_0001>

<bundles_post_ra>
// kernel: tpu_custom_call.1
= control target key start
LH: loop header
LB: loop body
LE: loop exit
PB: predicated region body
PF: predicated region fallthrough
CT: control target
= control target key end

     0   :  { %s2732_s0 = inlined_call_operand.vmem [shape: f32[2,8,64], index: 0, kind: input, shape index: {}]   ;;  %s2733_s1 = inlined_call_operand.vmem [shape: f32[2,8,32], index: 1, kind: input, shape index: {}]   ;;  %s2734_s2 = inlined_call_operand.vmem [shape: f32[64,32], index: 2, kind: input, shape index: {}]   ;;  %s2735_s3 = inlined_call_operand.hbm [shape: f32[1,32], index: 3, kind: input, shape index: {}]   ;;  %s2736_s4 = inlined_call_operand.vmem [shape: f32[32,64], index: 4, kind: input, shape index: {}]   ;;  %s2737_s5 = inlined_call_operand.hbm [shape: f32[1,64], index: 5, kind: input, shape index: {}]   ;;  %s2738_s6 = inlined_call_operand.vmem [shape: f32[64,32], index: 6, kind: input, shape index: {}]   ;;  %s2739_s7 = inlined_call_operand.hbm [shape: f32[1,32], index: 7, kind: input, shape index: {}]   ;;  %s2740_s8 = inlined_call_operand.vmem [shape: f32[32,32], index: 8, kind: input, shape index: {}]   ;;  %s2741_s9 = inlined_call_operand.vmem [shape: f32[32,16], index: 9, kind: input, shape index: {}]   ;;  %s2742_s10 = inlined_call_operand.hbm [shape: f32[1,16], index: 10, kind: input, shape index: {}]   ;;  %s2743_s11 = inlined_call_operand.vmem [shape: f32[16,32], index: 11, kind: input, shape index: {}]   ;;  %s2744_s12 = inlined_call_operand.vmem [shape: f32[1,32], index: 12, kind: input, shape index: {}]   ;;  %s2745_s13 = inlined_call_operand.vmem [shape: f32[2,32,64], index: 13, kind: input, shape index: {}]   ;;  %s2746_s14 = inlined_call_operand.vmem [shape: f32[2,1,64], index: 14, kind: input, shape index: {}]   ;;  %s2747_s15 = inlined_call_operand.hbm [shape: f32[2,2,8,64], index: 15, kind: output, shape index: {}]  }
   0x1   :  { %2759 = sst [smem:[#allocation23_spill]] %s2735_s3 }
   0x2   :  { %2760 = sst [smem:[#allocation24_spill]] %s2737_s5 }
   0x3   :  { %20 = vsyncpa [#allocation4], 0 }
   0x4   :  { %21 = vsyncpa [#allocation7], 0 }
   0x5   :  { %22 = vsyncpa [#allocation10], 0 }
   0x6   :  { %23 = vsyncpa [#allocation5], 0 }
   0x7   :  { %25 = vsyncpa [#allocation5 + $0x1], 0  ;;  %s2387_s18 = smov 0   ;;  %s2389_s19 = smov 0  }
   0x8   :  { %s2391_s20 = smov 0   ;;  %s2393_s21 = smov 0  }
   0x9   :  { %s2395_s22 = smov 0   ;;  %s2397_s23 = smov 0  }
   0xa LB: > { %2761 = sst [smem:[#allocation16_spill]] %s2276_s18  ;;  %s1779_s24 = sadd.s32 4294967295, %s2296_s23   ;;  %s2296_s23 = sphi %s2397_s23, %s31_s23   ;;  %s2292_s22 = sphi %s2395_s22, %s2785_s22   ;;  %s2288_s21 = sphi %s2393_s21, %s2784_s21   ;;  %s2284_s20 = sphi %s2391_s20, %s2783_s20   ;;  %s2280_s19 = sphi %s2389_s19, %s2787_s19   ;;  %s2276_s18 = sphi %s2387_s18, %s2786_s18  }
   0xb   : > { %2762 = sst [smem:[#allocation17_spill]] %s2284_s20  ;;  %s1780_s25 = sadd.s32 4294967294, %s2296_s23  }
   0xc   : > { %2763 = sst [smem:[#allocation18_spill]] %s2292_s22  ;;  %s40_s26 = sadd.s32 1, %s2292_s22 }
   0xd   : > { %2764 = sst [smem:[#allocation19_spill]] %s2296_s23  ;;  %s387_s27 = sadd.s32 1, %s2284_s20 }
   0xe   : > { %p41_p0 = scmp.ge.s32.totalorder %s40_s26, 2  ;;  %p397_p1 = scmp.ne.s32.totalorder %s2284_s20, %s2280_s19 }
   0xf   : > { %p398_p2 = scmp.eq.s32.totalorder %s1779_s24, 1  ;;  %p403_p3 = scmp.ne.s32.totalorder %s2280_s19, %s2276_s18 }
  0x10   : > { %s2789_s26 = smov (%p41_p0, %s40_s26), 0  ;;  %p404_p5 = scmp.eq.s32.totalorder %s1780_s25, 1 }
  0x11   : > { %2765 = sst [smem:[#allocation20_spill]] %s2789_s26  ;;  %p2427_p4 = por %p398_p2, %p397_p1 }
  0x12   : > { %s382_s29 = ssub.s32 %s2292_s22, %s2789_s26  ;;  %p1781_p6 = scmp.ge.s32.totalorder %s2296_s23, 1 }
  0x13   : > { %s2766_s28 = scalar_select %p2427_p4, 1, 0 }
  0x14   : > { %p385_p7 = scmp.eq.s32.totalorder %s382_s29, 0  ;;  %p2434_p8 = por %p404_p5, %p403_p3 }
  0x15   : > { %p411_p9 = scmp.lt.s32.totalorder %s2296_s23, 3  ;;  %p2446_p11 = scmp.eq.s32.totalorder %s1779_s24, 0 }
  0x16   : > { %s2767_s30 = scalar_select %p2434_p8, 1, 0 }
  0x17   : > { %s2440_s16 = scalar_select %p385_p7, %s2284_s20, %s387_s27  }
  0x18   : > { %2768 = sst [smem:[#allocation21_spill]] %s2767_s30  ;;  %p2442_p10 = pnand %p1781_p6, %p411_p9 }
  0x19   : > { %2769 = sst [smem:[#allocation22_spill]] %s2440_s16  ;;  %s2298_s25 = smov [#allocation6]  }
  0x1a   : > { %s2771_s18 = scalar_select %p2446_p11, 1, 0 }
  0x1b   : > { %p2014_p12 = pneg %p2442_p10  ;;  %s459_s29 = sshll.u32 %s2298_s25, 4  ;;  %s460_s29 = int_to_ptr.vmem [resolvable:$true] %s459_s29 }
  0x1c   : > { %s2299_s27 = smov [#allocation3]   ;;  %s2115_s24 = scalar_lea.vmem %s460_s29, 16 }
  0x1d   : > { %p2454_p13 = pnand %p2446_p11, %p2014_p12  ;;  %s445_s22 = sshll.u32 %s2299_s27, 4  ;;  %s446_s22 = int_to_ptr.vmem [resolvable:$true] %s445_s22 }
  0x1e   : > { %p2116_p1 = scmp.ne.s32.totalorder %s460_s29, %s2115_s24  ;;  %s2122_s25 = scalar_lea.vmem %s460_s29, 32 }
  0x1f   : > { %p2106_p0 = pneg %p2454_p13  ;;  %p2123_p5 = scmp.lt.s32.totalorder %s460_s29, %s460_s29 }
  0x20   : > { %p2124_p6 = scmp.lt.s32.totalorder %s2122_s25, %s2115_s24 }
  0x21   : > { %p2118_p2 = pnand %p2116_p1, %p2106_p0 }
  0x22   : > { %p2125_p7 = por %p2124_p6, %p2123_p5 }
  0x23   : > { %p2119_p3 = pneg %p2118_p2 }
  0x25   : > { %p2126_p9 = pnand %p2125_p7, %p2119_p3 }
  0x27   : > { %2129 = shalt.err (!%p2126_p9)
}
  0x28   : > { %s2773_s5 = sld [smem:[#allocation24_spill]]  ;;  %s2141_s27 = scalar_lea.vmem %s446_s22, 16 }
  0x29   : > { %p2142_p12 = scmp.ne.s32.totalorder %s446_s22, %s2141_s27  ;;  %s2148_s30 = scalar_lea.vmem %s446_s22, 32 }
  0x2a   : > { %p2149_p2 = scmp.lt.s32.totalorder %s446_s22, %s446_s22  ;;  %p2150_p4 = scmp.lt.s32.totalorder %s2148_s30, %s2141_s27 }
  0x2b   : > { %p2144_p8 = pnand %p2142_p12, %p2106_p0 }
  0x2c   : > { %p2151_p11 = por %p2150_p4, %p2149_p2 }
  0x2d   : > { %p2145_p1 = pneg %p2144_p8 }
  0x2e   : > { %2020 = dma.hbm_to_vmem [thread:$0]  (!%p2454_p13), %s2773_s5, 16, %s460_s29, [#allocation7]  }
  0x2f   : > { %p2152_p5 = pnand %p2151_p11, %p2145_p1 }
  0x31   : > { %2155 = shalt.err (!%p2152_p5)
}
  0x32   : > { %s2774_s3 = sld [smem:[#allocation23_spill]]  ;;  %s2300_s20 = smov [#allocation8]  }
  0x33   : > { %s473_s16 = sshll.u32 %s2300_s20, 4  ;;  %s2301_s29 = smov [#allocation9]   ;;  %s474_s16 = int_to_ptr.vmem [resolvable:$true] %s473_s16 }
  0x34   : > { %s490_s5 = sshll.u32 %s2301_s29, 4  ;;  %s2167_s23 = scalar_lea.vmem %s474_s16, 16  ;;  %s491_s5 = int_to_ptr.vmem [resolvable:$true] %s490_s5 }
  0x35   : > { %p2168_p8 = scmp.ne.s32.totalorder %s474_s16, %s2167_s23  ;;  %s2174_s30 = scalar_lea.vmem %s474_s16, 32 }
  0x36   : > { %p2175_p11 = scmp.lt.s32.totalorder %s474_s16, %s474_s16  ;;  %p2176_p6 = scmp.lt.s32.totalorder %s2174_s30, %s2167_s23 }
  0x37   : > { %p2170_p3 = pnand %p2168_p8, %p2106_p0 }
  0x38   : > { %2017 = dma.hbm_to_vmem [thread:$0]  (!%p2454_p13), %s2774_s3, 16, %s446_s22, [#allocation4]  }
  0x39   : > { %p2171_p4 = pneg %p2170_p3  ;;  %p2177_p7 = por %p2176_p6, %p2175_p11 }
  0x3b   : > { %p2178_p9 = pnand %p2177_p7, %p2171_p4 }
  0x3d   : > { %2181 = shalt.err (!%p2178_p9)
}
  0x3e   : > { %2023 = dma.hbm_to_vmem [thread:$0]  (!%p2454_p13), %s2739_s7, 16, %s474_s16, [#allocation7]  }
  0x3f   : > { %s2193_s24 = scalar_lea.vmem %s491_s5, 16  ;;  %s2200_s25 = scalar_lea.vmem %s491_s5, 32 }
  0x40   : > { %p2194_p12 = scmp.ne.s32.totalorder %s491_s5, %s2193_s24  ;;  %p2201_p5 = scmp.lt.s32.totalorder %s491_s5, %s491_s5 }
  0x41   : > { %p2202_p8 = scmp.lt.s32.totalorder %s2200_s25, %s2193_s24 }
  0x42   : > { %p2196_p1 = pnand %p2194_p12, %p2106_p0 }
  0x43   : > { %p2203_p3 = por %p2202_p8, %p2201_p5 }
  0x44   : > { %p2197_p2 = pneg %p2196_p1 }
  0x46   : > { %p2204_p4 = pnand %p2203_p3, %p2197_p2 }
  0x48   : > { %2207 = shalt.err (!%p2204_p4)
}
  0x49   : > { %2026 = dma.hbm_to_vmem [thread:$0]  (!%p2454_p13), %s2742_s10, 16, %s491_s5, [#allocation10]  }
  0x4a   : > { %523 = sbr.rel (%p2442_p10) target bundleno = 2226 (0x8b2), region = 80  ;;  %p2775_p11 = scmp.ne.s32.totalorder (!%p2442_p10), %s2771_s18, 0 }
  0x4f   : > { %2259 = dma.done.wait (%p2775_p11), [#allocation4], 16  }
  0x50   : > { %2261 = vsyncadd (%p2775_p11), [#allocation4], 4294967280 }
  0x51   : > { %2263 = dma.done.wait (%p2775_p11), [#allocation7], 32  }
  0x52   : > { %2265 = vsyncadd (%p2775_p11), [#allocation7], 4294967264 }
  0x53   : > { %2267 = dma.done.wait (%p2775_p11), [#allocation10], 16  }
  0x54   : > { %2269 = vsyncadd (%p2775_p11), [#allocation10], 4294967280  ;;  %s2758_s5 = sand.u32 1, %s2280_s19   ;;  %p608_p10 = scmp.lt.s32.totalorder %s2288_s21, 1 }
  0x55   : > { %s1794_s26 = sshll.u32 %s2758_s5, 4  ;;  %p1797_p13 = scmp.ne.s32.totalorder %s2288_s21, 0 }
  0x56   : > { %s2511_s17 = scalar_select %p608_p10, %s2288_s21, 1 }
  0x57   : > { %s2523_s25 = scalar_lea.vmem [#allocation11], %s1794_s26  ;;  %620 = sbr.rel (%p1797_p13) target bundleno = 2006 (0x7d6), region = 100 }
  0x58   : > { %s1829_s16 = sshll.u32 %s2511_s17, 5  ;;  %s615_s22 = scalar_lea.vmem %s2746_s14, %s2511_s17 }
  0x59   : > { %s2521_s24 = scalar_lea.vmem %s2745_s13, %s1829_s16 }
  0x5c   : > { %v632_v0 = vld [vmem:[%s2734_s2 + $0x38] sm:$0xff]  ;;  %v631_v1 = vld [vmem:[%s2734_s2 + $0x30] sm:$0xff]  ;;  %vm640_vm0 = vcmask 523264   ;;  %v630_v2 = vld [vmem:[%s2734_s2 + $0x28] sm:$0xff]  ;;  %vm735_vm1 = vcmask 261120   ;;  %v2302_v41 = vmov 0.0  }
  0x5d   : > { %1887 = vmatprep.subr.mxu0 %v632_v0  ;;  %v2538_v3 = vld [vmem:[%s2732_s0] sm:$0xff]  ;;  %v628_v5 = vld [vmem:[%s2734_s2 + $0x18] sm:$0xff]  ;;  %v627_v6 = vld [vmem:[%s2734_s2 + $0x10] sm:$0xff]  ;;  %vm2303_vm2 = vmmov 0   ;;  %vm1152_vm3 = vcmask 64512   ;;  %vm1426_vm4 = vcmask 130048  }
  0x5e   : > { %1888 = vmatpush3.msra.mxu0 %v632_v0  ;;  %1903 = vmatprep.mubr.msk.f32.mxu0 %vm640_vm0, %v2538_v3  ;;  %v629_v4 = vld [vmem:[%s2734_s2 + $0x20] sm:$0xff]  ;;  %v626_v7 = vld [vmem:[%s2734_s2 + $0x8] sm:$0xff]  ;;  %v727_v10 = vld [vmem:[%s2736_s4 + $0x18] sm:$0xff] }
  0x5f   : > { %1889 = vmatprep.subr.mxu0 %v631_v1  ;;  %v625_v8 = vld [vmem:[%s2734_s2] sm:$0xff]  ;;  %v622_v9 = vld [vmem:[%s2732_s0 + $0x8] sm:$0xff]  ;;  %1906 = vmatprep.subr.mxu1 %v727_v10  ;;  %v726_v11 = vld [vmem:[%s2736_s4 + $0x10] sm:$0xff] }
  0x60   : > { %1890 = vmatpush3.msra.mxu0 %v631_v1  ;;  %1907 = vmatpush3.msra.mxu1 %v727_v10  ;;  %v725_v12 = vld [vmem:[%s2736_s4 + $0x8] sm:$0xff]  ;;  %v724_v13 = vld [vmem:[%s2736_s4] sm:$0xff]  ;;  %v826_v14 = vld [vmem:[%s2738_s6 + $0x38] sm:$0xff] }
  0x61   : > { %1891 = vmatprep.subr.mxu0 %v630_v2  ;;  %1908 = vmatprep.subr.mxu1 %v726_v11  ;;  %v1798_v15 = vld [vmem:[#allocation3] ss:$0 sm:$0xff]  ;;  %v824_v23 = vld [vmem:[%s2738_s6 + $0x28] sm:$0xff]  ;;  %v823_v24 = vld [vmem:[%s2738_s6 + $0x20] sm:$0xff] }
  0x62   : > { %1892 = vmatpush3.msra.mxu0 %v630_v2  ;;  %1909 = vmatpush3.msra.mxu1 %v726_v11  ;;  %v825_v22 = vld [vmem:[%s2738_s6 + $0x30] sm:$0xff]  ;;  %v822_v25 = vld [vmem:[%s2738_s6 + $0x18] sm:$0xff]  ;;  %v820_v27 = vld [vmem:[%s2738_s6 + $0x8] sm:$0xff] }
  0x63   : > { %1893 = vmatprep.subr.mxu0 %v629_v4  ;;  %1910 = vmatprep.subr.mxu1 %v725_v12  ;;  %v821_v26 = vld [vmem:[%s2738_s6 + $0x10] sm:$0xff]  ;;  %v819_v28 = vld [vmem:[%s2738_s6] sm:$0xff]  ;;  %v918_v29 = vld [vmem:[%s2740_s8 + $0x18] sm:$0xff] }
  0x64   : > { %1894 = vmatpush3.msra.mxu0 %v629_v4  ;;  %1911 = vmatpush3.msra.mxu1 %v725_v12  ;;  %v1801_v30 = vld [vmem:[#allocation6] ss:$0 sm:$0xff]  ;;  %v916_v38 = vld [vmem:[%s2740_s8 + $0x8] sm:$0xff]  ;;  %v915_v39 = vld [vmem:[%s2740_s8] sm:$0xff] }
  0x65   : > { %1895 = vmatprep.subr.mxu0 %v628_v5  ;;  %1912 = vmatprep.subr.mxu1 %v724_v13  ;;  %v917_v37 = vld [vmem:[%s2740_s8 + $0x10] sm:$0xff]  ;;  %v624_v40 = vld [vmem:[%s2733_s1 + $0x8] sm:$0xff]  ;;  %v623_v47 = vld [vmem:[%s2733_s1] sm:$0xff] }
  0x66   : > { %1896 = vmatpush3.msra.mxu0 %v628_v5  ;;  %1913 = vmatpush3.msra.mxu1 %v724_v13  ;;  %v1804_v43 = vld [vmem:[#allocation8] ss:$0 sm:$0xff]  ;;  %v1326_v2 = vld [vmem:[%s2741_s9 + $0x18] sm:$0xff]  ;;  %v1324_v10 = vld [vmem:[%s2741_s9 + $0x8] sm:$0xff] }
  0x67   : > { %1897 = vmatprep.subr.mxu0 %v627_v6  ;;  %1917 = vmatprep.subr.mxu1 %v826_v14  ;;  %v1323_v11 = vld [vmem:[%s2741_s9] sm:$0xff] }
  0x68   : > { %1898 = vmatpush3.msra.mxu0 %v627_v6 }
  0x69   : > { %1899 = vmatprep.subr.mxu0 %v626_v7 }
  0x6a   : > { %1900 = vmatpush3.msra.mxu0 %v626_v7 }
  0x6b   : > { %1901 = vmatprep.subr.mxu0 %v625_v8 }
  0x6c   : > { %1902 = vmatpush3.msra.mxu0 %v625_v8 }
  0x6d   : > { %1904 = vmatmul.mubr.msk.f32.vlgmr.msra.gmra.mxu0 %vm640_vm0, %v622_v9  ;;  %1936 = vmatprep.subr.mxu0 %v918_v29 }
  0x6e   : > { %1937 = vmatpush3.msra.mxu0 %v918_v29 }
  0x6f   : > { %1938 = vmatprep.subr.mxu0 %v917_v37 }
  0x70   : > { %1939 = vmatpush3.msra.mxu0 %v917_v37 }
  0x71   : > { %1940 = vmatprep.subr.mxu0 %v916_v38 }
  0x72   : > { %1941 = vmatpush3.msra.mxu0 %v916_v38 }
  0x73   : > { %1942 = vmatprep.subr.mxu0 %v915_v39 }
  0x74   : > { %1943 = vmatpush3.msra.mxu0 %v915_v39 }
  0x75   : > { %1947 = vmatprep.subr.mxu0 %v2302_v41 }
 0x12d   : > { %v1905_v16 = vpop.f32.mrf.mxu0 }
 0x12e   : > { %v719_v17 = vadd.f32 %v1905_v16, %v1798_v15 }
 0x12f   : > { %v713_v18 = vpop.f32.mrf.mxu0 }
 0x130   : > { %v714_v19 = vadd.f32 %v1798_v15, %v713_v18  ;;  %v723_v21 = vmax.f32 %v719_v17, 0.0  ;;  %v1418_v18 = vld [vmem:[%s2743_s11 + $0x8] sm:$0xff] }
 0x132   : > { %v722_v20 = vmax.f32 %v714_v19, 0.0  ;;  %v1417_v19 = vld [vmem:[%s2743_s11] sm:$0xff] }
 0x134   : > { %1914 = vmatprep.mubr.msk.f32.mxu1 %vm735_vm1, %v722_v20  ;;  %v1815_v20 = vld [vmem:[#allocation9] ss:$0 sm:$0xff] }
 0x135   : > { %1915 = vmatmul.mubr.msk.f32.vlgmr.msra.gmra.mxu1 %vm735_vm1, %v723_v21 }
 0x136   : > { %1918 = vmatpush3.msra.mxu1 %v826_v14 }
 0x137   : > { %1919 = vmatprep.subr.mxu1 %v825_v22 }
 0x138   : > { %1920 = vmatpush3.msra.mxu1 %v825_v22 }
 0x139   : > { %1921 = vmatprep.subr.mxu1 %v824_v23 }
 0x13a   : > { %1922 = vmatpush3.msra.mxu1 %v824_v23 }
 0x13b   : > { %1923 = vmatprep.subr.mxu1 %v823_v24 }
 0x13c   : > { %1924 = vmatpush3.msra.mxu1 %v823_v24 }
 0x13d   : > { %1925 = vmatprep.subr.mxu1 %v822_v25 }
 0x13e   : > { %1926 = vmatpush3.msra.mxu1 %v822_v25 }
 0x13f   : > { %1927 = vmatprep.subr.mxu1 %v821_v26 }
 0x140   : > { %1928 = vmatpush3.msra.mxu1 %v821_v26 }
 0x141   : > { %1929 = vmatprep.subr.mxu1 %v820_v27 }
 0x142   : > { %1930 = vmatpush3.msra.mxu1 %v820_v27  ;;  %v1818_v27 = vld [vmem:[%s2744_s12] ss:$0 sm:$0xff] }
 0x143   : > { %1931 = vmatprep.subr.mxu1 %v819_v28 }
 0x144   : > { %1932 = vmatpush3.msra.mxu1 %v819_v28 }
 0x145   : > { %1952 = vmatprep.subr.mxu1 %v2302_v41 }
 0x1f5   : > { %v1916_v31 = vpop.f32.mrf.mxu1 }
 0x1f6   : > { %v814_v32 = vadd.f32 %v1916_v31, %v1801_v30 }
 0x1f7   : > { %v808_v33 = vpop.f32.mrf.mxu1 }
 0x1f8   : > { %v809_v34 = vadd.f32 %v1801_v30, %v808_v33  ;;  %v818_v36 = vadd.f32 %v814_v32, %v622_v9  ;;  %v1325_v9 = vld [vmem:[%s2741_s9 + $0x10] sm:$0xff] }
 0x1fa   : > { %v817_v35 = vadd.f32 %v809_v34, %v2538_v3 }
 0x1fc   : > { %1933 = vmatprep.mubr.msk.f32.mxu1 %vm640_vm0, %v817_v35 }
 0x1fd   : > { %1934 = vmatmul.mubr.msk.f32.vlgmr.msra.gmra.mxu1 %vm640_vm0, %v818_v36 }
 0x1fe   : > { %1953 = vmatpush3.xpose.msk.msra.mxu1 %vm735_vm1, %v624_v40  ;;  %1954 = vmatprep.mubr.msk.f32.mxu1 %vm2303_vm2, %v2302_v41 }
 0x1ff   : > { %1962 = vmatprep.subr.mxu1 %v2302_v41 }
 0x2bd   : > { %v1935_v42 = vpop.f32.mrf.mxu1 }
 0x2be   : > { %v2620_v46 = vadd.f32 %v1935_v42, %v1804_v43 }
 0x2bf   : > { %v906_v44 = vpop.f32.mrf.mxu1 }
 0x2c0   : > { %v2618_v45 = vadd.f32 %v1804_v43, %v906_v44 }
 0x2c2   : > { %1944 = vmatprep.mubr.msk.f32.mxu0 %vm735_vm1, %v2618_v45 }
 0x2c3   : > { %1945 = vmatmul.mubr.msk.f32.vlgmr.msra.gmra.mxu0 %vm735_vm1, %v2620_v46 }
 0x2c4   : > { %1948 = vmatpush3.xpose.msk.msra.mxu0 %vm735_vm1, %v623_v47  ;;  %1949 = vmatprep.mubr.msk.f32.mxu0 %vm2303_vm2, %v2302_v41 }
 0x2c5   : > { %1957 = vmatprep.subr.mxu0 %v2302_v41 }
 0x383   : > { %v1946_v48 = vpop.f32.mrf.mxu0 }
 0x384   : > { %1955 = vmatmul.mubr.msk.f32.vlgmr.msra.gmra.mxu1 %vm735_vm1, %v1946_v48 }
 0x385   : > { %v991_v49 = vpop.f32.mrf.mxu0  ;;  %1963 = vmatpush3.msra.mxu1 %v624_v40  ;;  %1964 = vmatprep.mubr.msk.f32.mxu1 %vm2303_vm2, %v2302_v41 }
 0x386   : > { %1950 = vmatmul.mubr.msk.f32.vlgmr.msra.gmra.mxu0 %vm735_vm1, %v991_v49  ;;  %1978 = vmatprep.subr.mxu1 %v1418_v18 }
 0x387   : > { %1958 = vmatpush3.msra.mxu0 %v623_v47  ;;  %1959 = vmatprep.mubr.msk.f32.mxu0 %vm2303_vm2, %v2302_v41 }
 0x388   : > { %1967 = vmatprep.subr.mxu0 %v1326_v2 }
 0x444   : > { %v1148_v50 = vpop.f32.mrf.mxu1 }
 0x445   : > { %v1156_v55 = vsel %vm1152_vm3, %v1148_v50, -inf }
 0x446   : > { %v1072_v51 = vpop.f32.mrf.mxu0  ;;  %v1956_v52 = vpop.f32.mrf.mxu1 }
 0x447   : > { %v1153_v53 = vsel %vm1152_vm3, %v1072_v51, -inf }
 0x448   : > { %1154 = vmax.xlane.f32.xlu0 %v1153_v53  ;;  %v1951_v54 = vpop.f32.mrf.mxu0 }
 0x44c   : > { %1157 = vmax.xlane.f32.xlu0 %v1156_v55 }
 0x4d1   : > { %v1155_v56 = vpop.xlane.xlu0 %1154 }
 0x4d2   : > { %v1159_v57 = vsub.f32 %v1072_v51, %v1155_v56 }
 0x4d4   : > { %v1161_v58 = vmul.f32 1.442695, %v1159_v57 }
 0x4d5   : > { %v1158_v59 = vpop.xlane.xlu0 %1157 }
 0x4d6   : > { %2096 = vpow2.f32 %v1161_v58  ;;  %v1160_v60 = vsub.f32 %v1148_v50, %v1158_v59 }
 0x4d8   : > { %v1163_v61 = vmul.f32 1.442695, %v1160_v60 }
 0x4da   : > { %2098 = vpow2.f32 %v1163_v61 }
 0x4e3   : > { %v2097_v62 = vpop.eup %2096 }
 0x4e4   : > { %v1165_v63 = vsel %vm1152_vm3, %v2097_v62, 0.0 }
 0x4e5   : > { %1166 = vadd.xlane.f32.xlu1 %v1165_v63 }
 0x4e7   : > { %v2099_v0 = vpop.eup %2098 }
 0x4e8   : > { %v1168_v1 = vsel %vm1152_vm3, %v2099_v0, 0.0 }
 0x4e9   : > { %1169 = vadd.xlane.f32.xlu1 %v1168_v1 }
 0x56e   : > { %v1167_v3 = vpop.xlane.xlu1 %1166 }
 0x56f   : > { %2100 = vrcp.f32 %v1167_v3 }
 0x572   : > { %v1170_v4 = vpop.xlane.xlu1 %1169 }
 0x573   : > { %2102 = vrcp.f32 %v1170_v4 }
 0x57c   : > { %v2101_v5 = vpop.eup %2100 }
 0x57d   : > { %v1173_v6 = vmul.f32 %v2101_v5, %v2097_v62 }
 0x57f   : > { %1960 = vmatmul.mubr.msk.f32.vlgmr.msra.gmra.mxu0 %vm1152_vm3, %v1173_v6 }
 0x580   : > { %v2103_v7 = vpop.eup %2102  ;;  %1968 = vmatpush3.msra.mxu0 %v1326_v2 }
 0x581   : > { %v1174_v8 = vmul.f32 %v2103_v7, %v2099_v0  ;;  %1969 = vmatprep.subr.mxu0 %v1325_v9 }
 0x582   : > { %1970 = vmatpush3.msra.mxu0 %v1325_v9 }
 0x583   : > { %1965 = vmatmul.mubr.msk.f32.vlgmr.msra.gmra.mxu1 %vm1152_vm3, %v1174_v8  ;;  %1971 = vmatprep.subr.mxu0 %v1324_v10 }
 0x584   : > { %1972 = vmatpush3.msra.mxu0 %v1324_v10  ;;  %1979 = vmatpush3.msra.mxu1 %v1418_v18 }
 0x585   : > { %1973 = vmatprep.subr.mxu0 %v1323_v11  ;;  %1980 = vmatprep.subr.mxu1 %v1417_v19 }
 0x586   : > { %1974 = vmatpush3.msra.mxu0 %v1323_v11  ;;  %1981 = vmatpush3.msra.mxu1 %v1417_v19 }
 0x63f   : > { %v1244_v12 = vpop.f32.mrf.mxu0 }
 0x640   : > { %v1321_v13 = vadd.f32 %v1244_v12, %v2618_v45 }
 0x641   : > { %v1961_v14 = vpop.f32.mrf.mxu0 }
 0x642   : > { %1975 = vmatprep.mubr.msk.f32.mxu0 %vm735_vm1, %v1321_v13 }
 0x643   : > { %v1317_v15 = vpop.f32.mrf.mxu1 }
 0x644   : > { %v1322_v16 = vadd.f32 %v1317_v15, %v2620_v46 }
 0x645   : > { %v1966_v17 = vpop.f32.mrf.mxu1 }
 0x646   : > { %1976 = vmatmul.mubr.msk.f32.vlgmr.msra.gmra.mxu0 %vm735_vm1, %v1322_v16 }
 0x706   : > { %v1977_v21 = vpop.f32.mrf.mxu0 }
 0x707   : > { %v1412_v22 = vadd.f32 %v1977_v21, %v1815_v20 }
 0x708   : > { %v1406_v23 = vpop.f32.mrf.mxu0 }
 0x709   : > { %v1407_v24 = vadd.f32 %v1815_v20, %v1406_v23  ;;  %v1416_v26 = vmax.f32 %v1412_v22, 0.0 }
 0x70b   : > { %v1415_v25 = vmax.f32 %v1407_v24, 0.0 }
 0x70d   : > { %1982 = vmatprep.mubr.msk.f32.mxu1 %vm1426_vm4, %v1415_v25 }
 0x70e   : > { %1983 = vmatmul.mubr.msk.f32.vlgmr.msra.gmra.mxu1 %vm1426_vm4, %v1416_v26 }
 0x7ce   : > { %v1984_v28 = vpop.f32.mrf.mxu1 }
 0x7cf   : > { %v1505_v29 = vadd.f32 %v1984_v28, %v1818_v27 }
 0x7d0   : > { %v1499_v30 = vpop.f32.mrf.mxu1 }
 0x7d1   : > { %v1509_v31 = vadd.f32 %v1505_v29, %v1322_v16  ;;  %v1500_v32 = vadd.f32 %v1818_v27, %v1499_v30 }
 0x7d3   : > { %1511 = vst.msk [vmem:[#allocation2 + $0x8] sm:$0xff] %vm735_vm1, %v1509_v31  ;;  %v1508_v33 = vadd.f32 %v1500_v32, %v1321_v13 }
 0x7d5   : > { %1510 = vst.msk [vmem:[#allocation2] sm:$0xff] %vm735_vm1, %v1508_v33 }
 0x7d6 PF: > { %v1517_v34 = vld [vmem:[%s2521_s24 + $0x18] sm:$0xff]  ;;  %v1516_v35 = vld [vmem:[%s2521_s24 + $0x10] sm:$0xff]  ;;  %vm1525_vm5 = vcmask 261120   ;;  %v1515_v37 = vld [vmem:[%s2521_s24 + $0x8] sm:$0xff]  ;;  %s1830_s23 = sshll.u32 %s2288_s21, 8  ;;  %s1626_s20 = sshll.u32 %s2523_s25, 4  ;;  %s2681_s20 = int_to_ptr.vmem [resolvable:$true] %s1626_s20 }
 0x7d7   : > { %1985 = vmatprep.subr.mxu0 %v1517_v34  ;;  %v1514_v38 = vld [vmem:[%s2521_s24] sm:$0xff]  ;;  %vm1607_vm6 = vcmask 523264   ;;  %s2679_s30 = scalar_lea.hbm %s2747_s15, %s1830_s23  ;;  %s2776_s17 = sand.u32 1, %s2280_s19  }
 0x7d8   : > { %1986 = vmatpush3.msra.mxu0 %v1517_v34  ;;  %v1821_v40 = vld [vmem:[%s615_s22] ss:$0 sm:$0xff]  ;;  %s2687_s21 = scalar_lea.sflag [#allocation5], %s2776_s17  ;;  %s2208_s22 = scalar_lea.vmem %s2681_s20, 256 }
 0x7d9   : > { %1987 = vmatprep.subr.mxu0 %v1516_v35  ;;  %p2209_p0 = scmp.ne.s32.totalorder %s2681_s20, %s2208_s22  ;;  %p2777_p6 = scmp.ne.s32.totalorder %s2766_s28, 0 }
 0x7da   : > { %1988 = vmatpush3.msra.mxu0 %v1516_v35  ;;  %v1513_v39 = vld [vmem:[#allocation2 + $0x8] sm:$0xff]  ;;  %s2304_s26 = smov [#allocation11]  }
 0x7db   : > { %1989 = vmatprep.subr.mxu0 %v1515_v37  ;;  %p2210_p7 = pnand %p2209_p0, %p2777_p6  ;;  %s2212_s16 = sshll.u32 %s2304_s26, 4  ;;  %s2213_s16 = int_to_ptr.vmem [resolvable:$false] %s2212_s16 }
 0x7dc   : > { %v1512_v36 = vld [vmem:[#allocation2] sm:$0xff]  ;;  %1990 = vmatpush3.msra.mxu0 %v1515_v37  ;;  %s2214_s27 = scalar_lea.vmem %s2213_s16, 512  ;;  %p2215_p12 = scmp.lt.s32.totalorder %s2681_s20, %s2213_s16 }
 0x7dd   : > { %1993 = vmatprep.mubr.msk.f32.mxu0 %vm1525_vm5, %v1512_v36  ;;  %1991 = vmatprep.subr.mxu0 %v1514_v38  ;;  %p2211_p9 = pneg %p2210_p7  ;;  %p2216_p1 = scmp.lt.s32.totalorder %s2214_s27, %s2208_s22 }
 0x7de   : > { %1992 = vmatpush3.msra.mxu0 %v1514_v38 }
 0x7df   : > { %1994 = vmatmul.mubr.msk.f32.vlgmr.msra.gmra.mxu0 %vm1525_vm5, %v1513_v39  ;;  %p2217_p2 = por %p2216_p1, %p2215_p12 }
 0x7e1   : > { %p2218_p5 = pnand %p2217_p2, %p2211_p9 }
 0x89f   : > { %v1995_v41 = vpop.f32.mrf.mxu0 }
 0x8a0   : > { %v1604_v42 = vadd.f32 %v1995_v41, %v1821_v40 }
 0x8a1   : > { %v1598_v43 = vpop.f32.mrf.mxu0 }
 0x8a2   : > { %1609 = vst.msk [vmem:[%s2523_s25 + $0x8] sm:$0xff] %vm1607_vm6, %v1604_v42  ;;  %v1599_v44 = vadd.f32 %v1821_v40, %v1598_v43 }
 0x8a4   : > { %1608 = vst.msk [vmem:[%s2523_s25] sm:$0xff] %vm1607_vm6, %v1599_v44 }
 0x8a5   : > { %2221 = shalt.err (!%p2218_p5)
}
 0x8a6   : > { %s2222_s25 = scalar_lea.hbm %s2679_s30, 256  ;;  %s2226_s18 = scalar_lea.hbm %s2747_s15, 512 }
 0x8a7   : > { %p2223_p8 = scmp.ne.s32.totalorder %s2679_s30, %s2222_s25  ;;  %p2227_p11 = scmp.lt.s32.totalorder %s2679_s30, %s2747_s15 }
 0x8a8   : > { %p2228_p10 = scmp.lt.s32.totalorder %s2226_s18, %s2222_s25 }
 0x8a9   : > { %p2224_p3 = pnand %p2223_p8, %p2777_p6 }
 0x8aa   : > { %p2229_p13 = por %p2228_p10, %p2227_p11 }
 0x8ab   : > { %p2225_p4 = pneg %p2224_p3 }
 0x8ad   : > { %p2230_p0 = pnand %p2229_p13, %p2225_p4 }
 0x8af   : > { %2233 = shalt.err (!%p2230_p0)
}
 0x8b0   : > { %s2305_s29 = smov 128   ;;  %s2306_s17 = smov 8  }
 0x8b1   : > { %2012 = dma.vmem_to_hbm [thread:$0]  (%p2777_p6), %s2681_s20, 256, %s2679_s30, %s2687_s21, %s2305_s29, %s2305_s29, %s2306_s17  }
 0x8b2 PF: > { %s2778_s22 = sld [smem:[#allocation19_spill]] }
 0x8b3   : > { %s2779_s26 = sld [smem:[#allocation16_spill]] }
 0x8b4   : > { %s2780_s16 = sld [smem:[#allocation21_spill]] }
 0x8b8   : > { %p2039_p7 = scmp.ge.s32.totalorder %s2778_s22, 2 }
 0x8b9   : > { %s1641_s27 = sand.u32 1, %s2779_s26  }
 0x8ba   : > { %p2781_p9 = scmp.ne.s32.totalorder %s2780_s16, 0  ;;  %s1642_s25 = scalar_lea.sflag [#allocation5], %s1641_s27 }
 0x8bc   : > { %p2028_p12 = pnand %p2039_p7, %p2781_p9 }
 0x8be   : > { %p2029_p1 = pneg %p2028_p12 }
 0x8c0   : > { %2271 = dma.done.wait (%p2029_p1), %s1642_s25, 256  }
 0x8c1   : > { %2273 = vsyncadd (%p2029_p1), %s1642_s25, 4294967040  ;;  %s31_s23 = sadd.s32 1, %s2778_s22   ;;  %s2782_s3 = sld [smem:[#allocation17_spill]] }
 0x8c2   : > { %p28_p2 = scmp.ge.s32.totalorder %s31_s23, 4   ;;  %s2783_s20 = sld [smem:[#allocation22_spill]] }
 0x8c3   : > { %s2784_s21 = sld [smem:[#allocation18_spill]]  ;;  %s2786_s18 = smov %s2280_s19 }
 0x8c4   : > { %s2785_s22 = sld [smem:[#allocation20_spill]]  ;;  %30 = sbr.rel (!%p28_p2) target bundleno = 10 (0xa), region = 145 }
 0x8c7   : > { %s2787_s19 = smov %s2782_s3 }
 0x8c9   :  { %1647 = vsyncpa [#allocation4], 1 }
 0x8ca   :  { %1649 = vsyncpa [#allocation4 + $0x1], 1 }
 0x8cb   :  { %1650 = vsyncpa [#allocation7], 1 }
 0x8cc   :  { %1651 = vsyncpa [#allocation10], 1 }
 0x8cd   :  { %1652 = vsyncpa [#allocation5], 1 }
 0x8ce   :  { %1654 = vsyncpa [#allocation5 + $0x1], 1 }

// kernel: tpu_custom_call.1
= control target key start
LH: loop header
LB: loop body
LE: loop exit
PB: predicated region body
PF: predicated region fallthrough
CT: control target
= control target key end

     0   :  { %s2732_s0 = inlined_call_operand.vmem [shape: f32[2,8,64], index: 0, kind: input, shape index: {}]   ;;  %s2733_s1 = inlined_call_operand.vmem [shape: f32[2,8,32], index: 1, kind: input, shape index: {}]   ;;  %s2734_s2 = inlined_call_operand.vmem [shape: f32[64,32], index: 2, kind: input, shape index: {}]   ;;  %s2735_s3 = inlined_call_operand.hbm [shape: f32[1,32], index: 3, kind: input, shape index: {}]   ;;  %s2736_s4 = inlined_call_operand.vmem [shape: f32[32,64], index: 4, kind: input, shape index: {}]   ;;  %s2737_s5 = inlined_call_operand.hbm [shape: f32[1,64], index: 5, kind: input, shape index: {}]   ;;  %s2738_s6 = inlined_call_operand.vmem [shape: f32[64,32], index: 6, kind: input, shape index: {}]   ;;  %s2739_s7 = inlined_call_operand.hbm [shape: f32[1,32], index: 7, kind: input, shape index: {}]   ;;  %s2740_s8 = inlined_call_operand.vmem [shape: f32[32,32], index: 8, kind: input, shape index: {}]   ;;  %s2741_s9 = inlined_call_operand.vmem [shape: f32[32,16], index: 9, kind: input, shape index: {}]   ;;  %s2742_s10 = inlined_call_operand.hbm [shape: f32[1,16], index: 10, kind: input, shape index: {}]   ;;  %s2743_s11 = inlined_call_operand.vmem [shape: f32[16,32], index: 11, kind: input, shape index: {}]   ;;  %s2744_s12 = inlined_call_operand.vmem [shape: f32[1,32], index: 12, kind: input, shape index: {}]   ;;  %s2745_s13 = inlined_call_operand.vmem [shape: f32[2,32,64], index: 13, kind: input, shape index: {}]   ;;  %s2746_s14 = inlined_call_operand.vmem [shape: f32[2,1,64], index: 14, kind: input, shape index: {}]   ;;  %s2747_s15 = inlined_call_operand.hbm [shape: f32[2,2,8,64], index: 15, kind: output, shape index: {}]  }
   0x1   :  { %2759 = sst [smem:[#allocation23_spill]] %s2735_s3 }
   0x2   :  { %2760 = sst [smem:[#allocation24_spill]] %s2737_s5 }
   0x3   :  { %20 = vsyncpa [#allocation4], 0 }
   0x4   :  { %21 = vsyncpa [#allocation7], 0 }
   0x5   :  { %22 = vsyncpa [#allocation10], 0 }
   0x6   :  { %23 = vsyncpa [#allocation5], 0 }
   0x7   :  { %25 = vsyncpa [#allocation5 + $0x1], 0  ;;  %s2387_s18 = smov 0   ;;  %s2389_s19 = smov 0  }
   0x8   :  { %s2391_s20 = smov 0   ;;  %s2393_s21 = smov 0  }
   0x9   :  { %s2395_s22 = smov 0   ;;  %s2397_s23 = smov 0  }
   0xa LB: > { %2761 = sst [smem:[#allocation16_spill]] %s2276_s18  ;;  %s1779_s24 = sadd.s32 4294967295, %s2296_s23   ;;  %s2296_s23 = sphi %s2397_s23, %s31_s23   ;;  %s2292_s22 = sphi %s2395_s22, %s2785_s22   ;;  %s2288_s21 = sphi %s2393_s21, %s2784_s21   ;;  %s2284_s20 = sphi %s2391_s20, %s2783_s20   ;;  %s2280_s19 = sphi %s2389_s19, %s2787_s19   ;;  %s2276_s18 = sphi %s2387_s18, %s2786_s18  }
   0xb   : > { %2762 = sst [smem:[#allocation17_spill]] %s2284_s20  ;;  %s1780_s25 = sadd.s32 4294967294, %s2296_s23  }
   0xc   : > { %2763 = sst [smem:[#allocation18_spill]] %s2292_s22  ;;  %s40_s26 = sadd.s32 1, %s2292_s22 }
   0xd   : > { %2764 = sst [smem:[#allocation19_spill]] %s2296_s23  ;;  %s387_s27 = sadd.s32 1, %s2284_s20 }
   0xe   : > { %p41_p0 = scmp.ge.s32.totalorder %s40_s26, 2  ;;  %p397_p1 = scmp.ne.s32.totalorder %s2284_s20, %s2280_s19 }
   0xf   : > { %p398_p2 = scmp.eq.s32.totalorder %s1779_s24, 1  ;;  %p403_p3 = scmp.ne.s32.totalorder %s2280_s19, %s2276_s18 }
  0x10   : > { %s2789_s26 = smov (%p41_p0, %s40_s26), 0  ;;  %p404_p5 = scmp.eq.s32.totalorder %s1780_s25, 1 }
  0x11   : > { %2765 = sst [smem:[#allocation20_spill]] %s2789_s26  ;;  %p2427_p4 = por %p398_p2, %p397_p1 }
  0x12   : > { %s382_s29 = ssub.s32 %s2292_s22, %s2789_s26  ;;  %p1781_p6 = scmp.ge.s32.totalorder %s2296_s23, 1 }
  0x13   : > { %s2766_s28 = scalar_select %p2427_p4, 1, 0 }
  0x14   : > { %p385_p7 = scmp.eq.s32.totalorder %s382_s29, 0  ;;  %p2434_p8 = por %p404_p5, %p403_p3 }
  0x15   : > { %p411_p9 = scmp.lt.s32.totalorder %s2296_s23, 3  ;;  %p2446_p11 = scmp.eq.s32.totalorder %s1779_s24, 0 }
  0x16   : > { %s2767_s30 = scalar_select %p2434_p8, 1, 0 }
  0x17   : > { %s2440_s16 = scalar_select %p385_p7, %s2284_s20, %s387_s27  }
  0x18   : > { %2768 = sst [smem:[#allocation21_spill]] %s2767_s30  ;;  %p2442_p10 = pnand %p1781_p6, %p411_p9 }
  0x19   : > { %2769 = sst [smem:[#allocation22_spill]] %s2440_s16  ;;  %s2298_s25 = smov [#allocation6]  }
  0x1a   : > { %s2771_s18 = scalar_select %p2446_p11, 1, 0 }
  0x1b   : > { %p2014_p12 = pneg %p2442_p10  ;;  %s459_s29 = sshll.u32 %s2298_s25, 4  ;;  %s460_s29 = int_to_ptr.vmem [resolvable:$true] %s459_s29 }
  0x1c   : > { %s2299_s27 = smov [#allocation3]   ;;  %s2115_s24 = scalar_lea.vmem %s460_s29, 16 }
  0x1d   : > { %p2454_p13 = pnand %p2446_p11, %p2014_p12  ;;  %s445_s22 = sshll.u32 %s2299_s27, 4  ;;  %s446_s22 = int_to_ptr.vmem [resolvable:$true] %s445_s22 }
  0x1e   : > { %p2116_p1 = scmp.ne.s32.totalorder %s460_s29, %s2115_s24  ;;  %s2122_s25 = scalar_lea.vmem %s460_s29, 32 }
  0x1f   : > { %p2106_p0 = pneg %p2454_p13  ;;  %p2123_p5 = scmp.lt.s32.totalorder %s460_s29, %s460_s29 }
  0x20   : > { %p2124_p6 = scmp.lt.s32.totalorder %s2122_s25, %s2115_s24 }
  0x21   : > { %p2118_p2 = pnand %p2116_p1, %p2106_p0 }
  0x22   : > { %p2125_p7 = por %p2124_p6, %p2123_p5 }
  0x23   : > { %p2119_p3 = pneg %p2118_p2 }
  0x25   : > { %p2126_p9 = pnand %p2125_p7, %p2119_p3 }
  0x27   : > { %2129 = shalt.err (!%p2126_p9)
}
  0x28   : > { %s2773_s5 = sld [smem:[#allocation24_spill]]  ;;  %s2141_s27 = scalar_lea.vmem %s446_s22, 16 }
  0x29   : > { %p2142_p12 = scmp.ne.s32.totalorder %s446_s22, %s2141_s27  ;;  %s2148_s30 = scalar_lea.vmem %s446_s22, 32 }
  0x2a   : > { %p2149_p2 = scmp.lt.s32.totalorder %s446_s22, %s446_s22  ;;  %p2150_p4 = scmp.lt.s32.totalorder %s2148_s30, %s2141_s27 }
  0x2b   : > { %p2144_p8 = pnand %p2142_p12, %p2106_p0 }
  0x2c   : > { %p2151_p11 = por %p2150_p4, %p2149_p2 }
  0x2d   : > { %p2145_p1 = pneg %p2144_p8 }
  0x2e   : > { %2020 = dma.hbm_to_vmem [thread:$0]  (!%p2454_p13), %s2773_s5, 16, %s460_s29, [#allocation7]  }
  0x2f   : > { %p2152_p5 = pnand %p2151_p11, %p2145_p1 }
  0x31   : > { %2155 = shalt.err (!%p2152_p5)
}
  0x32   : > { %s2774_s3 = sld [smem:[#allocation23_spill]]  ;;  %s2300_s20 = smov [#allocation8]  }
  0x33   : > { %s473_s16 = sshll.u32 %s2300_s20, 4  ;;  %s2301_s29 = smov [#allocation9]   ;;  %s474_s16 = int_to_ptr.vmem [resolvable:$true] %s473_s16 }
  0x34   : > { %s490_s5 = sshll.u32 %s2301_s29, 4  ;;  %s2167_s23 = scalar_lea.vmem %s474_s16, 16  ;;  %s491_s5 = int_to_ptr.vmem [resolvable:$true] %s490_s5 }
  0x35   : > { %p2168_p8 = scmp.ne.s32.totalorder %s474_s16, %s2167_s23  ;;  %s2174_s30 = scalar_lea.vmem %s474_s16, 32 }
  0x36   : > { %p2175_p11 = scmp.lt.s32.totalorder %s474_s16, %s474_s16  ;;  %p2176_p6 = scmp.lt.s32.totalorder %s2174_s30, %s2167_s23 }
  0x37   : > { %p2170_p3 = pnand %p2168_p8, %p2106_p0 }
  0x38   : > { %2017 = dma.hbm_to_vmem [thread:$0]  (!%p2454_p13), %s2774_s3, 16, %s446_s22, [#allocation4]  }
  0x39   : > { %p2171_p4 = pneg %p2170_p3  ;;  %p2177_p7 = por %p2176_p6, %p2175_p11 }
  0x3b   : > { %p2178_p9 = pnand %p2177_p7, %p2171_p4 }
  0x3d   : > { %2181 = shalt.err (!%p2178_p9)
}
  0x3e   : > { %2023 = dma.hbm_to_vmem [thread:$0]  (!%p2454_p13), %s2739_s7, 16, %s474_s16, [#allocation7]  }
  0x3f   : > { %s2193_s24 = scalar_lea.vmem %s491_s5, 16  ;;  %s2200_s25 = scalar_lea.vmem %s491_s5, 32 }
  0x40   : > { %p2194_p12 = scmp.ne.s32.totalorder %s491_s5, %s2193_s24  ;;  %p2201_p5 = scmp.lt.s32.totalorder %s491_s5, %s491_s5 }
  0x41   : > { %p2202_p8 = scmp.lt.s32.totalorder %s2200_s25, %s2193_s24 }
  0x42   : > { %p2196_p1 = pnand %p2194_p12, %p2106_p0 }
  0x43   : > { %p2203_p3 = por %p2202_p8, %p2201_p5 }
  0x44   : > { %p2197_p2 = pneg %p2196_p1 }
  0x46   : > { %p2204_p4 = pnand %p2203_p3, %p2197_p2 }
  0x48   : > { %2207 = shalt.err (!%p2204_p4)
}
  0x49   : > { %2026 = dma.hbm_to_vmem [thread:$0]  (!%p2454_p13), %s2742_s10, 16, %s491_s5, [#allocation10]  }
  0x4a   : > { %523 = sbr.rel (%p2442_p10) target bundleno = 2226 (0x8b2), region = 80  ;;  %p2775_p11 = scmp.ne.s32.totalorder (!%p2442_p10), %s2771_s18, 0 }
  0x4f   : > { %2259 = dma.done.wait (%p2775_p11), [#allocation4], 16  }
  0x50   : > { %2261 = vsyncadd (%p2775_p11), [#allocation4], 4294967280 }
  0x51   : > { %2263 = dma.done.wait (%p2775_p11), [#allocation7], 32  }
  0x52   : > { %2265 = vsyncadd (%p2775_p11), [#allocation7], 4294967264 }
  0x53   : > { %2267 = dma.done.wait (%p2775_p11), [#allocation10], 16  }
  0x54   : > { %2269 = vsyncadd (%p2775_p11), [#allocation10], 4294967280  ;;  %s2758_s5 = sand.u32 1, %s2280_s19   ;;  %p608_p10 = scmp.lt.s32.totalorder %s2288_s21, 1 }
  0x55   : > { %s1794_s26 = sshll.u32 %s2758_s5, 4  ;;  %p1797_p13 = scmp.ne.s32.totalorder %s2288_s21, 0 }
  0x56   : > { %s2511_s17 = scalar_select %p608_p10, %s2288_s21, 1 }
  0x57   : > { %s2523_s25 = scalar_lea.vmem [#allocation11], %s1794_s26  ;;  %620 = sbr.rel (%p1797_p13) target bundleno = 2006 (0x7d6), region = 100 }
  0x58   : > { %s1829_s16 = sshll.u32 %s2511_s17, 5  ;;  %s615_s22 = scalar_lea.vmem %s2746_s14, %s2511_s17 }
  0x59   : > { %s2521_s24 = scalar_lea.vmem %s2745_s13, %s1829_s16 }
  0x5c   : > { %v632_v0 = vld [vmem:[%s2734_s2 + $0x38] sm:$0xff]  ;;  %v631_v1 = vld [vmem:[%s2734_s2 + $0x30] sm:$0xff]  ;;  %vm640_vm0 = vcmask 523264   ;;  %v630_v2 = vld [vmem:[%s2734_s2 + $0x28] sm:$0xff]  ;;  %vm735_vm1 = vcmask 261120   ;;  %v2302_v41 = vmov 0.0  }
  0x5d   : > { %1887 = vmatprep.subr.mxu0 %v632_v0  ;;  %v2538_v3 = vld [vmem:[%s2732_s0] sm:$0xff]  ;;  %v628_v5 = vld [vmem:[%s2734_s2 + $0x18] sm:$0xff]  ;;  %v627_v6 = vld [vmem:[%s2734_s2 + $0x10] sm:$0xff]  ;;  %vm2303_vm2 = vmmov 0   ;;  %vm1152_vm3 = vcmask 64512   ;;  %vm1426_vm4 = vcmask 130048  }
  0x5e   : > { %1888 = vmatpush3.msra.mxu0 %v632_v0  ;;  %1903 = vmatprep.mubr.msk.f32.mxu0 %vm640_vm0, %v2538_v3  ;;  %v629_v4 = vld [vmem:[%s2734_s2 + $0x20] sm:$0xff]  ;;  %v626_v7 = vld [vmem:[%s2734_s2 + $0x8] sm:$0xff]  ;;  %v727_v10 = vld [vmem:[%s2736_s4 + $0x18] sm:$0xff] }
  0x5f   : > { %1889 = vmatprep.subr.mxu0 %v631_v1  ;;  %v625_v8 = vld [vmem:[%s2734_s2] sm:$0xff]  ;;  %v622_v9 = vld [vmem:[%s2732_s0 + $0x8] sm:$0xff]  ;;  %1906 = vmatprep.subr.mxu1 %v727_v10  ;;  %v726_v11 = vld [vmem:[%s2736_s4 + $0x10] sm:$0xff] }
  0x60   : > { %1890 = vmatpush3.msra.mxu0 %v631_v1  ;;  %1907 = vmatpush3.msra.mxu1 %v727_v10  ;;  %v725_v12 = vld [vmem:[%s2736_s4 + $0x8] sm:$0xff]  ;;  %v724_v13 = vld [vmem:[%s2736_s4] sm:$0xff]  ;;  %v826_v14 = vld [vmem:[%s2738_s6 + $0x38] sm:$0xff] }
  0x61   : > { %1891 = vmatprep.subr.mxu0 %v630_v2  ;;  %1908 = vmatprep.subr.mxu1 %v726_v11  ;;  %v1798_v15 = vld [vmem:[#allocation3] ss:$0 sm:$0xff]  ;;  %v824_v23 = vld [vmem:[%s2738_s6 + $0x28] sm:$0xff]  ;;  %v823_v24 = vld [vmem:[%s2738_s6 + $0x20] sm:$0xff] }
  0x62   : > { %1892 = vmatpush3.msra.mxu0 %v630_v2  ;;  %1909 = vmatpush3.msra.mxu1 %v726_v11  ;;  %v825_v22 = vld [vmem:[%s2738_s6 + $0x30] sm:$0xff]  ;;  %v822_v25 = vld [vmem:[%s2738_s6 + $0x18] sm:$0xff]  ;;  %v820_v27 = vld [vmem:[%s2738_s6 + $0x8] sm:$0xff] }
  0x63   : > { %1893 = vmatprep.subr.mxu0 %v629_v4  ;;  %1910 = vmatprep.subr.mxu1 %v725_v12  ;;  %v821_v26 = vld [vmem:[%s2738_s6 + $0x10] sm:$0xff]  ;;  %v819_v28 = vld [vmem:[%s2738_s6] sm:$0xff]  ;;  %v918_v29 = vld [vmem:[%s2740_s8 + $0x18] sm:$0xff] }
  0x64   : > { %1894 = vmatpush3.msra.mxu0 %v629_v4  ;;  %1911 = vmatpush3.msra.mxu1 %v725_v12  ;;  %v1801_v30 = vld [vmem:[#allocation6] ss:$0 sm:$0xff]  ;;  %v916_v38 = vld [vmem:[%s2740_s8 + $0x8] sm:$0xff]  ;;  %v915_v39 = vld [vmem:[%s2740_s8] sm:$0xff] }
  0x65   : > { %1895 = vmatprep.subr.mxu0 %v628_v5  ;;  %1912 = vmatprep.subr.mxu1 %v724_v13  ;;  %v917_v37 = vld [vmem:[%s2740_s8 + $0x10] sm:$0xff]  ;;  %v624_v40 = vld [vmem:[%s2733_s1 + $0x8] sm:$0xff]  ;;  %v623_v47 = vld [vmem:[%s2733_s1] sm:$0xff] }
  0x66   : > { %1896 = vmatpush3.msra.mxu0 %v628_v5  ;;  %1913 = vmatpush3.msra.mxu1 %v724_v13  ;;  %v1804_v43 = vld [vmem:[#allocation8] ss:$0 sm:$0xff]  ;;  %v1326_v2 = vld [vmem:[%s2741_s9 + $0x18] sm:$0xff]  ;;  %v1324_v10 = vld [vmem:[%s2741_s9 + $0x8] sm:$0xff] }
  0x67   : > { %1897 = vmatprep.subr.mxu0 %v627_v6  ;;  %1917 = vmatprep.subr.mxu1 %v826_v14  ;;  %v1323_v11 = vld [vmem:[%s2741_s9] sm:$0xff] }
  0x68   : > { %1898 = vmatpush3.msra.mxu0 %v627_v6 }
  0x69   : > { %1899 = vmatprep.subr.mxu0 %v626_v7 }
  0x6a   : > { %1900 = vmatpush3.msra.mxu0 %v626_v7 }
  0x6b   : > { %1901 = vmatprep.subr.mxu0 %v625_v8 }
  0x6c   : > { %1902 = vmatpush3.msra.mxu0 %v625_v8 }
  0x6d   : > { %1904 = vmatmul.mubr.msk.f32.vlgmr.msra.gmra.mxu0 %vm640_vm0, %v622_v9  ;;  %1936 = vmatprep.subr.mxu0 %v918_v29 }
  0x6e   : > { %1937 = vmatpush3.msra.mxu0 %v918_v29 }
  0x6f   : > { %1938 = vmatprep.subr.mxu0 %v917_v37 }
  0x70   : > { %1939 = vmatpush3.msra.mxu0 %v917_v37 }
  0x71   : > { %1940 = vmatprep.subr.mxu0 %v916_v38 }
  0x72   : > { %1941 = vmatpush3.msra.mxu0 %v916_v38 }
  0x73   : > { %1942 = vmatprep.subr.mxu0 %v915_v39 }
  0x74   : > { %1943 = vmatpush3.msra.mxu0 %v915_v39 }
  0x75   : > { %1947 = vmatprep.subr.mxu0 %v2302_v41 }
 0x12d   : > { %v1905_v16 = vpop.f32.mrf.mxu0 }
 0x12e   : > { %v719_v17 = vadd.f32 %v1905_v16, %v1798_v15 }
 0x12f   : > { %v713_v18 = vpop.f32.mrf.mxu0 }
 0x130   : > { %v714_v19 = vadd.f32 %v1798_v15, %v713_v18  ;;  %v723_v21 = vmax.f32 %v719_v17, 0.0  ;;  %v1418_v18 = vld [vmem:[%s2743_s11 + $0x8] sm:$0xff] }
 0x132   : > { %v722_v20 = vmax.f32 %v714_v19, 0.0  ;;  %v1417_v19 = vld [vmem:[%s2743_s11] sm:$0xff] }
 0x134   : > { %1914 = vmatprep.mubr.msk.f32.mxu1 %vm735_vm1, %v722_v20  ;;  %v1815_v20 = vld [vmem:[#allocation9] ss:$0 sm:$0xff] }
 0x135   : > { %1915 = vmatmul.mubr.msk.f32.vlgmr.msra.gmra.mxu1 %vm735_vm1, %v723_v21 }
 0x136   : > { %1918 = vmatpush3.msra.mxu1 %v826_v14 }
 0x137   : > { %1919 = vmatprep.subr.mxu1 %v825_v22 }
 0x138   : > { %1920 = vmatpush3.msra.mxu1 %v825_v22 }
 0x139   : > { %1921 = vmatprep.subr.mxu1 %v824_v23 }
 0x13a   : > { %1922 = vmatpush3.msra.mxu1 %v824_v23 }
 0x13b   : > { %1923 = vmatprep.subr.mxu1 %v823_v24 }
 0x13c   : > { %1924 = vmatpush3.msra.mxu1 %v823_v24 }
 0x13d   : > { %1925 = vmatprep.subr.mxu1 %v822_v25 }
 0x13e   : > { %1926 = vmatpush3.msra.mxu1 %v822_v25 }
 0x13f   : > { %1927 = vmatprep.subr.mxu1 %v821_v26 }
 0x140   : > { %1928 = vmatpush3.msra.mxu1 %v821_v26 }
 0x141   : > { %1929 = vmatprep.subr.mxu1 %v820_v27 }
 0x142   : > { %1930 = vmatpush3.msra.mxu1 %v820_v27  ;;  %v1818_v27 = vld [vmem:[%s2744_s12] ss:$0 sm:$0xff] }
 0x143   : > { %1931 = vmatprep.subr.mxu1 %v819_v28 }
 0x144   : > { %1932 = vmatpush3.msra.mxu1 %v819_v28 }
 0x145   : > { %1952 = vmatprep.subr.mxu1 %v2302_v41 }
 0x1f5   : > { %v1916_v31 = vpop.f32.mrf.mxu1 }
 0x1f6   : > { %v814_v32 = vadd.f32 %v1916_v31, %v1801_v30 }
 0x1f7   : > { %v808_v33 = vpop.f32.mrf.mxu1 }
 0x1f8   : > { %v809_v34 = vadd.f32 %v1801_v30, %v808_v33  ;;  %v818_v36 = vadd.f32 %v814_v32, %v622_v9  ;;  %v1325_v9 = vld [vmem:[%s2741_s9 + $0x10] sm:$0xff] }
 0x1fa   : > { %v817_v35 = vadd.f32 %v809_v34, %v2538_v3 }
 0x1fc   : > { %1933 = vmatprep.mubr.msk.f32.mxu1 %vm640_vm0, %v817_v35 }
 0x1fd   : > { %1934 = vmatmul.mubr.msk.f32.vlgmr.msra.gmra.mxu1 %vm640_vm0, %v818_v36 }
 0x1fe   : > { %1953 = vmatpush3.xpose.msk.msra.mxu1 %vm735_vm1, %v624_v40  ;;  %1954 = vmatprep.mubr.msk.f32.mxu1 %vm2303_vm2, %v2302_v41 }
 0x1ff   : > { %1962 = vmatprep.subr.mxu1 %v2302_v41 }
 0x2bd   : > { %v1935_v42 = vpop.f32.mrf.mxu1 }
 0x2be   : > { %v2620_v46 = vadd.f32 %v1935_v42, %v1804_v43 }
 0x2bf   : > { %v906_v44 = vpop.f32.mrf.mxu1 }
 0x2c0   : > { %v2618_v45 = vadd.f32 %v1804_v43, %v906_v44 }
 0x2c2   : > { %1944 = vmatprep.mubr.msk.f32.mxu0 %vm735_vm1, %v2618_v45 }
 0x2c3   : > { %1945 = vmatmul.mubr.msk.f32.vlgmr.msra.gmra.mxu0 %vm735_vm1, %v2620_v46 }
 0x2c4   : > { %1948 = vmatpush3.xpose.msk.msra.mxu0 %vm735_vm1, %v623_v47  ;;  %1949 = vmatprep.mubr.msk.f32.mxu0 %vm2303_vm2, %v2302_v41 }
 0x2c5   : > { %1957 = vmatprep.subr.mxu0 %v2302_v41 }
 0x383   : > { %v1946_v48 = vpop.f32.mrf.mxu0 }
 0x384   : > { %1955 = vmatmul.mubr.msk.f32.vlgmr.msra.gmra.mxu1 %vm735_vm1, %v1946_v48 }
 0x385   : > { %v991_v49 = vpop.f32.mrf.mxu0  ;;  %1963 = vmatpush3.msra.mxu1 %v624_v40  ;;  %1964 = vmatprep.mubr.msk.f32.mxu1 %vm2303_vm2, %v2302_v41 }
 0x386   : > { %1950 = vmatmul.mubr.msk.f32.vlgmr.msra.gmra.mxu0 %vm735_vm1, %v991_v49  ;;  %1978 = vmatprep.subr.mxu1 %v1418_v18 }
 0x387   : > { %1958 = vmatpush3.msra.mxu0 %v623_v47  ;;  %1959 = vmatprep.mubr.msk.f32.mxu0 %vm2303_vm2, %v2302_v41 }
 0x388   : > { %1967 = vmatprep.subr.mxu0 %v1326_v2 }
 0x444   : > { %v1148_v50 = vpop.f32.mrf.mxu1 }
 0x445   : > { %v1156_v55 = vsel %vm1152_vm3, %v1148_v50, -inf }
 0x446   : > { %v1072_v51 = vpop.f32.mrf.mxu0  ;;  %v1956_v52 = vpop.f32.mrf.mxu1 }
 0x447   : > { %v1153_v53 = vsel %vm1152_vm3, %v1072_v51, -inf }
 0x448   : > { %1154 = vmax.xlane.f32.xlu0 %v1153_v53  ;;  %v1951_v54 = vpop.f32.mrf.mxu0 }
 0x44c   : > { %1157 = vmax.xlane.f32.xlu0 %v1156_v55 }
 0x4d1   : > { %v1155_v56 = vpop.xlane.xlu0 %1154 }
 0x4d2   : > { %v1159_v57 = vsub.f32 %v1072_v51, %v1155_v56 }
 0x4d4   : > { %v1161_v58 = vmul.f32 1.442695, %v1159_v57 }
 0x4d5   : > { %v1158_v59 = vpop.xlane.xlu0 %1157 }
 0x4d6   : > { %2096 = vpow2.f32 %v1161_v58  ;;  %v1160_v60 = vsub.f32 %v1148_v50, %v1158_v59 }
 0x4d8   : > { %v1163_v61 = vmul.f32 1.442695, %v1160_v60 }
 0x4da   : > { %2098 = vpow2.f32 %v1163_v61 }
 0x4e3   : > { %v2097_v62 = vpop.eup %2096 }
 0x4e4   : > { %v1165_v63 = vsel %vm1152_vm3, %v2097_v62, 0.0 }
 0x4e5   : > { %1166 = vadd.xlane.f32.xlu1 %v1165_v63 }
 0x4e7   : > { %v2099_v0 = vpop.eup %2098 }
 0x4e8   : > { %v1168_v1 = vsel %vm1152_vm3, %v2099_v0, 0.0 }
 0x4e9   : > { %1169 = vadd.xlane.f32.xlu1 %v1168_v1 }
 0x56e   : > { %v1167_v3 = vpop.xlane.xlu1 %1166 }
 0x56f   : > { %2100 = vrcp.f32 %v1167_v3 }
 0x572   : > { %v1170_v4 = vpop.xlane.xlu1 %1169 }
 0x573   : > { %2102 = vrcp.f32 %v1170_v4 }
 0x57c   : > { %v2101_v5 = vpop.eup %2100 }
 0x57d   : > { %v1173_v6 = vmul.f32 %v2101_v5, %v2097_v62 }
 0x57f   : > { %1960 = vmatmul.mubr.msk.f32.vlgmr.msra.gmra.mxu0 %vm1152_vm3, %v1173_v6 }
 0x580   : > { %v2103_v7 = vpop.eup %2102  ;;  %1968 = vmatpush3.msra.mxu0 %v1326_v2 }
 0x581   : > { %v1174_v8 = vmul.f32 %v2103_v7, %v2099_v0  ;;  %1969 = vmatprep.subr.mxu0 %v1325_v9 }
 0x582   : > { %1970 = vmatpush3.msra.mxu0 %v1325_v9 }
 0x583   : > { %1965 = vmatmul.mubr.msk.f32.vlgmr.msra.gmra.mxu1 %vm1152_vm3, %v1174_v8  ;;  %1971 = vmatprep.subr.mxu0 %v1324_v10 }
 0x584   : > { %1972 = vmatpush3.msra.mxu0 %v1324_v10  ;;  %1979 = vmatpush3.msra.mxu1 %v1418_v18 }
 0x585   : > { %1973 = vmatprep.subr.mxu0 %v1323_v11  ;;  %1980 = vmatprep.subr.mxu1 %v1417_v19 }
 0x586   : > { %1974 = vmatpush3.msra.mxu0 %v1323_v11  ;;  %1981 = vmatpush3.msra.mxu1 %v1417_v19 }
 0x63f   : > { %v1244_v12 = vpop.f32.mrf.mxu0 }
 0x640   : > { %v1321_v13 = vadd.f32 %v1244_v12, %v2618_v45 }
 0x641   : > { %v1961_v14 = vpop.f32.mrf.mxu0 }
 0x642   : > { %1975 = vmatprep.mubr.msk.f32.mxu0 %vm735_vm1, %v1321_v13 }
 0x643   : > { %v1317_v15 = vpop.f32.mrf.mxu1 }
 0x644   : > { %v1322_v16 = vadd.f32 %v1317_v15, %v2620_v46 }
 0x645   : > { %v1966_v17 = vpop.f32.mrf.mxu1 }
 0x646   : > { %1976 = vmatmul.mubr.msk.f32.vlgmr.msra.gmra.mxu0 %vm735_vm1, %v1322_v16 }
 0x706   : > { %v1977_v21 = vpop.f32.mrf.mxu0 }
 0x707   : > { %v1412_v22 = vadd.f32 %v1977_v21, %v1815_v20 }
 0x708   : > { %v1406_v23 = vpop.f32.mrf.mxu0 }
 0x709   : > { %v1407_v24 = vadd.f32 %v1815_v20, %v1406_v23  ;;  %v1416_v26 = vmax.f32 %v1412_v22, 0.0 }
 0x70b   : > { %v1415_v25 = vmax.f32 %v1407_v24, 0.0 }
 0x70d   : > { %1982 = vmatprep.mubr.msk.f32.mxu1 %vm1426_vm4, %v1415_v25 }
 0x70e   : > { %1983 = vmatmul.mubr.msk.f32.vlgmr.msra.gmra.mxu1 %vm1426_vm4, %v1416_v26 }
 0x7ce   : > { %v1984_v28 = vpop.f32.mrf.mxu1 }
 0x7cf   : > { %v1505_v29 = vadd.f32 %v1984_v28, %v1818_v27 }
 0x7d0   : > { %v1499_v30 = vpop.f32.mrf.mxu1 }
 0x7d1   : > { %v1509_v31 = vadd.f32 %v1505_v29, %v1322_v16  ;;  %v1500_v32 = vadd.f32 %v1818_v27, %v1499_v30 }
 0x7d3   : > { %1511 = vst.msk [vmem:[#allocation2 + $0x8] sm:$0xff] %vm735_vm1, %v1509_v31  ;;  %v1508_v33 = vadd.f32 %v1500_v32, %v1321_v13 }
 0x7d5   : > { %1510 = vst.msk [vmem:[#allocation2] sm:$0xff] %vm735_vm1, %v1508_v33 }
 0x7d6 PF: > { %v1517_v34 = vld [vmem:[%s2521_s24 + $0x18] sm:$0xff]  ;;  %v1516_v35 = vld [vmem:[%s2521_s24 + $0x10] sm:$0xff]  ;;  %vm1525_vm5 = vcmask 261120   ;;  %v1515_v37 = vld [vmem:[%s2521_s24 + $0x8] sm:$0xff]  ;;  %s1830_s23 = sshll.u32 %s2288_s21, 8  ;;  %s1626_s20 = sshll.u32 %s2523_s25, 4  ;;  %s2681_s20 = int_to_ptr.vmem [resolvable:$true] %s1626_s20 }
 0x7d7   : > { %1985 = vmatprep.subr.mxu0 %v1517_v34  ;;  %v1514_v38 = vld [vmem:[%s2521_s24] sm:$0xff]  ;;  %vm1607_vm6 = vcmask 523264   ;;  %s2679_s30 = scalar_lea.hbm %s2747_s15, %s1830_s23  ;;  %s2776_s17 = sand.u32 1, %s2280_s19  }
 0x7d8   : > { %1986 = vmatpush3.msra.mxu0 %v1517_v34  ;;  %v1821_v40 = vld [vmem:[%s615_s22] ss:$0 sm:$0xff]  ;;  %s2687_s21 = scalar_lea.sflag [#allocation5], %s2776_s17  ;;  %s2208_s22 = scalar_lea.vmem %s2681_s20, 256 }
 0x7d9   : > { %1987 = vmatprep.subr.mxu0 %v1516_v35  ;;  %p2209_p0 = scmp.ne.s32.totalorder %s2681_s20, %s2208_s22  ;;  %p2777_p6 = scmp.ne.s32.totalorder %s2766_s28, 0 }
 0x7da   : > { %1988 = vmatpush3.msra.mxu0 %v1516_v35  ;;  %v1513_v39 = vld [vmem:[#allocation2 + $0x8] sm:$0xff]  ;;  %s2304_s26 = smov [#allocation11]  }
 0x7db   : > { %1989 = vmatprep.subr.mxu0 %v1515_v37  ;;  %p2210_p7 = pnand %p2209_p0, %p2777_p6  ;;  %s2212_s16 = sshll.u32 %s2304_s26, 4  ;;  %s2213_s16 = int_to_ptr.vmem [resolvable:$false] %s2212_s16 }
 0x7dc   : > { %v1512_v36 = vld [vmem:[#allocation2] sm:$0xff]  ;;  %1990 = vmatpush3.msra.mxu0 %v1515_v37  ;;  %s2214_s27 = scalar_lea.vmem %s2213_s16, 512  ;;  %p2215_p12 = scmp.lt.s32.totalorder %s2681_s20, %s2213_s16 }
 0x7dd   : > { %1993 = vmatprep.mubr.msk.f32.mxu0 %vm1525_vm5, %v1512_v36  ;;  %1991 = vmatprep.subr.mxu0 %v1514_v38  ;;  %p2211_p9 = pneg %p2210_p7  ;;  %p2216_p1 = scmp.lt.s32.totalorder %s2214_s27, %s2208_s22 }
 0x7de   : > { %1992 = vmatpush3.msra.mxu0 %v1514_v38 }
 0x7df   : > { %1994 = vmatmul.mubr.msk.f32.vlgmr.msra.gmra.mxu0 %vm1525_vm5, %v1513_v39  ;;  %p2217_p2 = por %p2216_p1, %p2215_p12 }
 0x7e1   : > { %p2218_p5 = pnand %p2217_p2, %p2211_p9 }
 0x89f   : > { %v1995_v41 = vpop.f32.mrf.mxu0 }
 0x8a0   : > { %v1604_v42 = vadd.f32 %v1995_v41, %v1821_v40 }
 0x8a1   : > { %v1598_v43 = vpop.f32.mrf.mxu0 }
 0x8a2   : > { %1609 = vst.msk [vmem:[%s2523_s25 + $0x8] sm:$0xff] %vm1607_vm6, %v1604_v42  ;;  %v1599_v44 = vadd.f32 %v1821_v40, %v1598_v43 }
 0x8a4   : > { %1608 = vst.msk [vmem:[%s2523_s25] sm:$0xff] %vm1607_vm6, %v1599_v44 }
 0x8a5   : > { %2221 = shalt.err (!%p2218_p5)
}
 0x8a6   : > { %s2222_s25 = scalar_lea.hbm %s2679_s30, 256  ;;  %s2226_s18 = scalar_lea.hbm %s2747_s15, 512 }
 0x8a7   : > { %p2223_p8 = scmp.ne.s32.totalorder %s2679_s30, %s2222_s25  ;;  %p2227_p11 = scmp.lt.s32.totalorder %s2679_s30, %s2747_s15 }
 0x8a8   : > { %p2228_p10 = scmp.lt.s32.totalorder %s2226_s18, %s2222_s25 }
 0x8a9   : > { %p2224_p3 = pnand %p2223_p8, %p2777_p6 }
 0x8aa   : > { %p2229_p13 = por %p2228_p10, %p2227_p11 }
 0x8ab   : > { %p2225_p4 = pneg %p2224_p3 }
 0x8ad   : > { %p2230_p0 = pnand %p2229_p13, %p2225_p4 }
 0x8af   : > { %2233 = shalt.err (!%p2230_p0)
}
 0x8b0   : > { %s2305_s29 = smov 128   ;;  %s2306_s17 = smov 8  }
 0x8b1   : > { %2012 = dma.vmem_to_hbm [thread:$0]  (%p2777_p6), %s2681_s20, 256, %s2679_s30, %s2687_s21, %s2305_s29, %s2305_s29, %s2306_s17  }
 0x8b2 PF: > { %s2778_s22 = sld [smem:[#allocation19_spill]] }
 0x8b3   : > { %s2779_s26 = sld [smem:[#allocation16_spill]] }
 0x8b4   : > { %s2780_s16 = sld [smem:[#allocation21_spill]] }
 0x8b8   : > { %p2039_p7 = scmp.ge.s32.totalorder %s2778_s22, 2 }
 0x8b9   : > { %s1641_s27 = sand.u32 1, %s2779_s26  }
 0x8ba   : > { %p2781_p9 = scmp.ne.s32.totalorder %s2780_s16, 0  ;;  %s1642_s25 = scalar_lea.sflag [#allocation5], %s1641_s27 }
 0x8bc   : > { %p2028_p12 = pnand %p2039_p7, %p2781_p9 }
 0x8be   : > { %p2029_p1 = pneg %p2028_p12 }
 0x8c0   : > { %2271 = dma.done.wait (%p2029_p1), %s1642_s25, 256  }
 0x8c1   : > { %2273 = vsyncadd (%p2029_p1), %s1642_s25, 4294967040  ;;  %s31_s23 = sadd.s32 1, %s2778_s22   ;;  %s2782_s3 = sld [smem:[#allocation17_spill]] }
 0x8c2   : > { %p28_p2 = scmp.ge.s32.totalorder %s31_s23, 4   ;;  %s2783_s20 = sld [smem:[#allocation22_spill]] }
 0x8c3   : > { %s2784_s21 = sld [smem:[#allocation18_spill]]  ;;  %s2786_s18 = smov %s2280_s19 }
 0x8c4   : > { %s2785_s22 = sld [smem:[#allocation20_spill]]  ;;  %30 = sbr.rel (!%p28_p2) target bundleno = 10 (0xa), region = 145 }
 0x8c7   : > { %s2787_s19 = smov %s2782_s3 }
 0x8c9   :  { %1647 = vsyncpa [#allocation4], 1 }
 0x8ca   :  { %1649 = vsyncpa [#allocation4 + $0x1], 1 }
 0x8cb   :  { %1650 = vsyncpa [#allocation7], 1 }
 0x8cc   :  { %1651 = vsyncpa [#allocation10], 1 }
 0x8cd   :  { %1652 = vsyncpa [#allocation5], 1 }
 0x8ce   :  { %1654 = vsyncpa [#allocation5 + $0x1], 1 }

</bundles_post_ra>
